<compile_context>
chip_gen: v7x
topology: tpu7x:2x2x1
jax: 0.10.0
libtpu: 0.0.40
codegen_flags: <defaults>
</compile_context>

<pallas_src>
import functools
import math

import jax
import jax.numpy as jnp
from jax.experimental import pallas as pl
from jax.experimental.pallas import tpu as pltpu


# ------------------------------ tiling helpers -------------------------------

def _tile_pad(dim, target, align):
    """Pick a block size for `dim`. Returns (tile, padded_dim).

    Prefers (a) the full dim when small (block == full array dim is always
    legal), (b) an `align`-multiple divisor of `dim`, and only then falls back
    to padding `dim` up to a multiple of an aligned tile (caller masks/slices).
    """
    if dim <= target:
        return dim, dim
    step = max(align, (target // align) * align)
    t = step
    while t >= align:
        if dim % t == 0:
            return t, dim
        t -= align
    tile = step
    return tile, ((dim + tile - 1) // tile) * tile


def _attn_block(t, target):
    """Block size along the sequence axis (multiple of 8, divides t)."""
    if t <= target:
        return t
    for align in (128, 8):
        b = (target // align) * align
        while b >= align:
            if t % b == 0:
                return b
            b -= align
    return t


def _device_defaults():
    """Per-TPU-generation tile / scoped-VMEM defaults."""
    try:
        kind = jax.devices()[0].device_kind.lower()
    except Exception:
        kind = ""
    if "v7" in kind:   # 64 MiB physical VMEM, 3.2 TB/s HBM -> tm=512 suffices
        return dict(tm=512, tn=512, tv=2048, vmem=48 << 20)
    if "v6" in kind:   # ~640 flops/byte needed on the weight stream -> tm=1024
        return dict(tm=1024, tn=512, tv=2048, vmem=64 << 20)
    if "v5" in kind:   # ~240 flops/byte; 16 MiB scoped default is the binder
        return dict(tm=512, tn=256, tv=1024, vmem=28 << 20)
    return dict(tm=512, tn=512, tv=1024, vmem=32 << 20)


# ----------------------- fused LayerNorm + Linear ----------------------------

def _fused_linear_kernel(*refs, ln, residual, activation, eps):
    idx = 0
    x_ref = refs[idx]; idx += 1
    w_ref = refs[idx]; idx += 1
    b_ref = refs[idx]; idx += 1
    if ln:
        g_ref = refs[idx]; idx += 1
        beta_ref = refs[idx]; idx += 1
    if residual:
        res_ref = refs[idx]; idx += 1
    o_ref = refs[idx]; idx += 1
    if ln:
        xn_ref = refs[idx]; idx += 1   # VMEM scratch: cached ln(x) row tile

    if ln:
        # compute LN(x) once per row tile (j == 0), reuse for all column tiles
        @pl.when(pl.program_id(1) == 0)
        def _():
            x = x_ref[...].astype(jnp.float32)
            n = x.shape[-1]
            s1 = jnp.sum(x, axis=-1, keepdims=True)
            s2 = jnp.sum(x * x, axis=-1, keepdims=True)
            mu = s1 * (1.0 / n)
            var = s2 * (1.0 / n) - mu * mu
            xhat = (x - mu) * jax.lax.rsqrt(var + eps)
            xn_ref[...] = (xhat * g_ref[...].astype(jnp.float32)
                           + beta_ref[...].astype(jnp.float32)
                           ).astype(jnp.bfloat16)
        xin = xn_ref[...]
    else:
        xin = x_ref[...]
        if xin.dtype != jnp.bfloat16:     # projections already feed bf16
            xin = xin.astype(jnp.bfloat16)

    y = jnp.dot(xin, w_ref[...], preferred_element_type=jnp.float32)
    y = y + b_ref[...].astype(jnp.float32)

    if activation == "gelu_new":          # GPT-2 tanh-approx GELU (f32)
        c = math.sqrt(2.0 / math.pi)
        y = 0.5 * y * (1.0 + jnp.tanh(c * (y + 0.044715 * y * y * y)))

    if residual:
        y = y + res_ref[...].astype(jnp.float32)

    o_ref[...] = y.astype(o_ref.dtype)


def fused_linear(x, w, bias, *, ln_params=None, residual=None, activation=None,
                 out_dtype=jnp.bfloat16, eps=1e-5,
                 tm_target=512, tn_target=512, vmem_limit=32 << 20):
    m, k = x.shape
    k2, n = w.shape
    assert k == k2
    tm, mp = _tile_pad(m, tm_target, 8)
    tn, np_ = _tile_pad(n, tn_target, 128)

    if mp != m:
        x = jnp.pad(x, ((0, mp - m), (0, 0)))
    if np_ != n:
        w = jnp.pad(w, ((0, 0), (0, np_ - n)))
        bias = jnp.pad(bias, (0, np_ - n))
    if residual is not None and (mp != m or np_ != n):
        residual = jnp.pad(residual, ((0, mp - m), (0, np_ - n)))

    grid = (mp // tm, np_ // tn)

    in_specs = [
        pl.BlockSpec((tm, k), lambda i, j: (i, 0)),   # activations (full K row)
        pl.BlockSpec((k, tn), lambda i, j: (0, j)),   # weights (bf16)
        pl.BlockSpec((1, tn), lambda i, j: (0, j)),   # bias
    ]
    args = [x, w, bias.reshape(1, np_)]

    has_ln = ln_params is not None
    has_res = residual is not None
    if has_ln:
        g, beta = ln_params
        in_specs += [pl.BlockSpec((1, k), lambda i, j: (0, 0)),
                     pl.BlockSpec((1, k), lambda i, j: (0, 0))]
        args += [g.reshape(1, k), beta.reshape(1, k)]
    if has_res:
        in_specs += [pl.BlockSpec((tm, tn), lambda i, j: (i, j))]
        args += [residual]

    scratch = [pltpu.VMEM((tm, k), jnp.bfloat16)] if has_ln else []

    kernel = functools.partial(_fused_linear_kernel, ln=has_ln,
                               residual=has_res, activation=activation, eps=eps)
    out = pl.pallas_call(
        kernel,
        grid=grid,
        in_specs=in_specs,
        out_specs=pl.BlockSpec((tm, tn), lambda i, j: (i, j)),
        out_shape=jax.ShapeDtypeStruct((mp, np_), out_dtype),
        scratch_shapes=scratch,
        compiler_params=pltpu.CompilerParams(
            dimension_semantics=("parallel", "arbitrary"),
            vmem_limit_bytes=vmem_limit),
    )(*args)

    if mp != m or np_ != n:
        out = out[:m, :n]
    return out


# --------------------- flash-style causal self-attention ----------------------

def _flash_attn_kernel(q_ref, k_ref, v_ref, o_ref, m_sc, l_sc, acc_sc,
                       *, scale, tq, tkv):
    iq = pl.program_id(2)
    ik = pl.program_id(3)
    nk = pl.num_programs(3)

    @pl.when(ik == 0)
    def _():
        m_sc[...] = jnp.full_like(m_sc, -jnp.inf)
        l_sc[...] = jnp.zeros_like(l_sc)
        acc_sc[...] = jnp.zeros_like(acc_sc)

    q_start = iq * tq
    kv_start = ik * tkv

    # skip kv blocks that are entirely above the causal diagonal
    @pl.when(kv_start <= q_start + tq - 1)
    def _():
        q = q_ref[...] * scale                      # fold 1/sqrt(d) into q
        s = jax.lax.dot_general(q, k_ref[...], (((1,), (1,)), ((), ())),
                                preferred_element_type=jnp.float32)
        row = jax.lax.broadcasted_iota(jnp.int32, (tq, tkv), 0) + q_start
        col = jax.lax.broadcasted_iota(jnp.int32, (tq, tkv), 1) + kv_start
        s = jnp.where(col <= row, s, -1e30)

        m_prev = m_sc[...]
        m_new = jnp.maximum(m_prev, jnp.max(s, axis=-1, keepdims=True))
        alpha = jnp.exp(m_prev - m_new)
        p = jnp.exp(s - m_new)                      # unnormalized probabilities
        l_sc[...] = alpha * l_sc[...] + jnp.sum(p, axis=-1, keepdims=True)
        acc_sc[...] = alpha * acc_sc[...] + jnp.dot(
            p.astype(jnp.bfloat16), v_ref[...],
            preferred_element_type=jnp.float32)
        m_sc[...] = m_new

    @pl.when(ik == nk - 1)
    def _():
        # deferred normalization: divide the [tq, d] output, not the [tq, tkv] p
        inv = pl.reciprocal(l_sc[...], approx=True)
        o_ref[...] = (acc_sc[...] * inv).astype(o_ref.dtype)


def attention(qkv, b, t, n_head):
    h3 = qkv.shape[-1]
    hsz = h3 // 3
    d = hsz // n_head

    # head-major layout so each (head, q/kv block) is a contiguous aligned DMA
    qkv_t = jnp.transpose(qkv.reshape(b, t, 3, n_head, d),
                          (0, 2, 3, 1, 4))          # (b, 3, n_head, t, d)

    tq = _attn_block(t, 256)
    tkv = _attn_block(t, 512)
    grid = (b, n_head, t // tq, t // tkv)
    scale = 1.0 / math.sqrt(d)

    out = pl.pallas_call(
        functools.partial(_flash_attn_kernel, scale=scale, tq=tq, tkv=tkv),
        grid=grid,
        in_specs=[
            pl.BlockSpec((None, None, None, tq, d),
                         lambda ib, ih, iq, ik: (ib, 0, ih, iq, 0)),
            pl.BlockSpec((None, None, None, tkv, d),
                         lambda ib, ih, iq, ik: (ib, 1, ih, ik, 0)),
            pl.BlockSpec((None, None, None, tkv, d),
                         lambda ib, ih, iq, ik: (ib, 2, ih, ik, 0)),
        ],
        out_specs=pl.BlockSpec((None, None, tq, d),
                               lambda ib, ih, iq, ik: (ib, ih, iq, 0)),
        out_shape=jax.ShapeDtypeStruct((b, n_head, t, d), jnp.bfloat16),
        scratch_shapes=[
            pltpu.VMEM((tq, 1), jnp.float32),    # running max
            pltpu.VMEM((tq, 1), jnp.float32),    # running sum-exp
            pltpu.VMEM((tq, d), jnp.float32),    # output accumulator
        ],
        compiler_params=pltpu.CompilerParams(
            dimension_semantics=("parallel", "parallel", "parallel",
                                 "arbitrary")),
    )(qkv_t, qkv_t, qkv_t)

    # back to token-major (B*T, H) for the projection matmul
    return jnp.transpose(out, (0, 2, 1, 3)).reshape(b * t, hsz)


# ---------------- fused ln_f + tied lm_head + cross-entropy -------------------

def _lmhead_ce_kernel(x_ref, g_ref, b_ref, wte_ref, lbl_ref, msk_ref,
                      loss_ref, xn_ref, m_ref, l_ref, ll_ref, *,
                      eps, tv, v_actual, vocab_padded):
    j = pl.program_id(1)
    nv = pl.num_programs(1)

    @pl.when(j == 0)
    def _():
        x = x_ref[...].astype(jnp.float32)
        n = x.shape[-1]
        s1 = jnp.sum(x, axis=-1, keepdims=True)
        s2 = jnp.sum(x * x, axis=-1, keepdims=True)
        mu = s1 * (1.0 / n)
        var = s2 * (1.0 / n) - mu * mu
        xhat = (x - mu) * jax.lax.rsqrt(var + eps)
        xn_ref[...] = (xhat * g_ref[...].astype(jnp.float32)
                       + b_ref[...].astype(jnp.float32)).astype(jnp.bfloat16)
        m_ref[...] = jnp.full_like(m_ref, -jnp.inf)
        l_ref[...] = jnp.zeros_like(l_ref)
        ll_ref[...] = jnp.zeros_like(ll_ref)

    # logits tile [tm, tv]: contract hidden dim of wte directly (no wte.T copy)
    logits = jax.lax.dot_general(
        xn_ref[...], wte_ref[...], (((1,), (1,)), ((), ())),
        preferred_element_type=jnp.float32)

    col = jax.lax.broadcasted_iota(jnp.int32, logits.shape, 1) + j * tv
    if vocab_padded:                       # mask zero-padded vocab columns
        logits = jnp.where(col < v_actual, logits, -1e30)

    # online logsumexp across vocab tiles
    m_prev = m_ref[...]
    m_new = jnp.maximum(m_prev, jnp.max(logits, axis=-1, keepdims=True))
    l_ref[...] = (l_ref[...] * jnp.exp(m_prev - m_new)
                  + jnp.sum(jnp.exp(logits - m_new), axis=-1, keepdims=True))
    m_ref[...] = m_new

    # per-tile label pick (no full-vocab one-hot)
    hit = col == lbl_ref[...]
    ll_ref[...] = ll_ref[...] + jnp.sum(
        jnp.where(hit, logits, 0.0), axis=-1, keepdims=True)

    @pl.when(j == nv - 1)
    def _():
        lse = m_ref[...] + jnp.log(l_ref[...])
        loss_ref[...] = (lse - ll_ref[...]) * msk_ref[...]


def lmhead_ce(x, g, b, wte, labels, loss_mask, *, eps=1e-5,
              tm_target=512, tv_target=1024, vmem_limit=32 << 20):
    m, h = x.shape
    v = wte.shape[0]
    tm, mp = _tile_pad(m, tm_target, 8)
    tv, vp = _tile_pad(v, tv_target, 128)

    labels = labels.reshape(-1).astype(jnp.int32)
    loss_mask = loss_mask.reshape(-1).astype(jnp.float32)
    if mp != m:
        x = jnp.pad(x, ((0, mp - m), (0, 0)))
        labels = jnp.pad(labels, (0, mp - m))          # padded rows get mask 0
        loss_mask = jnp.pad(loss_mask, (0, mp - m))
    if vp != v:
        wte = jnp.pad(wte, ((0, vp - v), (0, 0)))      # padded cols masked -inf

    grid = (mp // tm, vp // tv)

    losses = pl.pallas_call(
        functools.partial(_lmhead_ce_kernel, eps=eps, tv=tv, v_actual=v,
                          vocab_padded=(vp != v)),
        grid=grid,
        in_specs=[
            pl.BlockSpec((tm, h), lambda i, j: (i, 0)),   # residual stream
            pl.BlockSpec((1, h), lambda i, j: (0, 0)),    # ln_f gamma
            pl.BlockSpec((1, h), lambda i, j: (0, 0)),    # ln_f beta
            pl.BlockSpec((tv, h), lambda i, j: (j, 0)),   # tied wte vocab tile
            pl.BlockSpec((tm, 1), lambda i, j: (i, 0)),   # labels
            pl.BlockSpec((tm, 1), lambda i, j: (i, 0)),   # loss mask
        ],
        out_specs=pl.BlockSpec((tm, 1), lambda i, j: (i, 0)),
        out_shape=jax.ShapeDtypeStruct((mp, 1), jnp.float32),
        scratch_shapes=[
            pltpu.VMEM((tm, h), jnp.bfloat16),   # cached ln_f(x) tile
            pltpu.VMEM((tm, 1), jnp.float32),    # running max
            pltpu.VMEM((tm, 1), jnp.float32),    # running sum-exp
            pltpu.VMEM((tm, 1), jnp.float32),    # label logit
        ],
        compiler_params=pltpu.CompilerParams(
            dimension_semantics=("parallel", "arbitrary"),
            vmem_limit_bytes=vmem_limit),
    )(x, g.reshape(1, h), b.reshape(1, h), wte,
      labels.reshape(mp, 1), loss_mask.reshape(mp, 1))
    return jnp.sum(losses)            # padded rows contribute exactly 0


# ----------------------------- GPT-2 model glue -------------------------------

def make_params(key, *, vocab, hidden, n_layer, max_pos):
    keys = jax.random.split(key, 2 + n_layer)

    def init(k, shape):  # matmul weights live in bf16 (MXU-native)
        return (jax.random.normal(k, shape, dtype=jnp.float32) * 0.02
                ).astype(jnp.bfloat16)

    inner = 4 * hidden
    params = {
        "wte": init(keys[0], (vocab, hidden)),
        "wpe": init(keys[1], (max_pos, hidden)),
        "ln_f_g": jnp.ones((hidden,), jnp.float32),
        "ln_f_b": jnp.zeros((hidden,), jnp.float32),
        "layers": [],
    }
    for i in range(n_layer):
        lk = jax.random.split(keys[2 + i], 4)
        params["layers"].append({
            "ln1_g": jnp.ones((hidden,), jnp.float32),
            "ln1_b": jnp.zeros((hidden,), jnp.float32),
            "w_attn": init(lk[0], (hidden, 3 * hidden)),
            "b_attn": jnp.zeros((3 * hidden,), jnp.float32),
            "w_attn_proj": init(lk[1], (hidden, hidden)),
            "b_attn_proj": jnp.zeros((hidden,), jnp.float32),
            "ln2_g": jnp.ones((hidden,), jnp.float32),
            "ln2_b": jnp.zeros((hidden,), jnp.float32),
            "w_fc": init(lk[2], (hidden, inner)),
            "b_fc": jnp.zeros((inner,), jnp.float32),
            "w_mlp_proj": init(lk[3], (inner, hidden)),
            "b_mlp_proj": jnp.zeros((hidden,), jnp.float32),
        })
    return params


def gpt2_wrapper_forward(params, input_ids, labels, loss_mask, *, n_head):
    cfg = _device_defaults()
    b, t = input_ids.shape
    hsz = params["wte"].shape[1]

    # embeddings (gather is glue); residual stream is f32
    pos = jnp.arange(t)
    x = (params["wte"][input_ids].astype(jnp.float32)
         + params["wpe"][pos][None, :, :].astype(jnp.float32))
    x = x.reshape(b * t, hsz)

    lin = functools.partial(fused_linear, tm_target=cfg["tm"],
                            tn_target=cfg["tn"], vmem_limit=cfg["vmem"])

    for lp in params["layers"]:
        # attention block: LN1 fused into QKV matmul, residual fused into proj
        qkv = lin(x, lp["w_attn"], lp["b_attn"],
                  ln_params=(lp["ln1_g"], lp["ln1_b"]),
                  out_dtype=jnp.bfloat16)
        attn_out = attention(qkv, b, t, n_head)
        x = lin(attn_out, lp["w_attn_proj"], lp["b_attn_proj"],
                residual=x, out_dtype=jnp.float32)
        # MLP block: LN2 + gelu_new fused into fc matmul, residual into proj
        hmid = lin(x, lp["w_fc"], lp["b_fc"],
                   ln_params=(lp["ln2_g"], lp["ln2_b"]),
                   activation="gelu_new", out_dtype=jnp.bfloat16)
        x = lin(hmid, lp["w_mlp_proj"], lp["b_mlp_proj"],
                residual=x, out_dtype=jnp.float32)

    # ln_f + tied lm_head + masked-sum cross entropy, logits never hit HBM
    return lmhead_ce(x, params["ln_f_g"], params["ln_f_b"], params["wte"],
                     labels, loss_mask, tm_target=cfg["tm"],
                     tv_target=cfg["tv"], vmem_limit=cfg["vmem"])


# ---------------------------------- main --------------------------------------

if __name__ == "__main__":
    B, T = 2, 8
    VOCAB, HIDDEN, N_HEAD, N_LAYER, MAX_POS = 64, 32, 4, 2, 16

    key = jax.random.PRNGKey(0)
    kp, ki, kl, km = jax.random.split(key, 4)

    params = make_params(kp, vocab=VOCAB, hidden=HIDDEN,
                         n_layer=N_LAYER, max_pos=MAX_POS)
    input_ids = jax.random.randint(ki, (B, T), 0, VOCAB, dtype=jnp.int32)
    labels = jax.random.randint(kl, (B, T), 0, VOCAB, dtype=jnp.int32)
    loss_mask = (jax.random.uniform(km, (B, T)) > 0.3).astype(jnp.float32)

    fwd = jax.jit(functools.partial(gpt2_wrapper_forward, n_head=N_HEAD))
    loss = fwd(params, input_ids, labels, loss_mask)
    loss = jax.block_until_ready(loss)
    assert loss.shape == () and jnp.isfinite(loss)
    print("KERNEL_OK")
</pallas_src>

<mosaic_0001>
module attributes {stable_mosaic.version = 11 : i64} {
  func.func @_fused_linear_kernel(%arg0: i32, %arg1: i32, %arg2: memref<16x32xf32, #tpu.memory_space<vmem>>, %arg3: memref<32x96xbf16, #tpu.memory_space<vmem>>, %arg4: memref<1x96xf32, #tpu.memory_space<vmem>>, %arg5: memref<1x32xf32, #tpu.memory_space<vmem>>, %arg6: memref<1x32xf32, #tpu.memory_space<vmem>>, %arg7: memref<16x96xbf16, #tpu.memory_space<vmem>>, %arg8: memref<16x32xbf16, #tpu.memory_space<vmem>>) attributes {dimension_semantics = [#tpu.dimension_semantics<parallel>, #tpu.dimension_semantics<arbitrary>], iteration_bounds = array<i64: 1, 1>, scalar_prefetch = 0 : i64, scratch_operands = 1 : i64, tpu.core_type = #tpu.core_type<tc>, window_params = [{transform_indices = @transform_0, window_bounds = array<i64: 16, 32>}, {transform_indices = @transform_1, window_bounds = array<i64: 32, 96>}, {transform_indices = @transform_2, window_bounds = array<i64: 1, 96>}, {pipeline_mode = #tpu.pipeline_mode<synchronous>, transform_indices = @transform_3, window_bounds = array<i64: 1, 32>}, {pipeline_mode = #tpu.pipeline_mode<synchronous>, transform_indices = @transform_4, window_bounds = array<i64: 1, 32>}, {transform_indices = @transform_5, window_bounds = array<i64: 16, 96>}]} {
    %c0_i32 = arith.constant 0 : i32
    %0 = arith.cmpi eq, %arg1, %c0_i32 : i32
    %1 = arith.extui %0 : i1 to i32
    %c0_i32_0 = arith.constant 0 : i32
    %2 = arith.cmpi ne, %1, %c0_i32_0 : i32
    scf.if %2 {
      %c0_8 = arith.constant 0 : index
      %c0_9 = arith.constant 0 : index
      %11 = vector.load %arg2[%c0_8, %c0_9] : memref<16x32xf32, #tpu.memory_space<vmem>>, vector<16x32xf32>
      %cst_10 = arith.constant dense<0.000000e+00> : vector<16xf32>
      %12 = vector.multi_reduction <add>, %11, %cst_10 [1] : vector<16x32xf32> to vector<16xf32>
      %13 = vector.shape_cast %12 : vector<16xf32> to vector<16x1xf32>
      %14 = arith.mulf %11, %11 : vector<16x32xf32>
      %cst_11 = arith.constant dense<0.000000e+00> : vector<16xf32>
      %15 = vector.multi_reduction <add>, %14, %cst_11 [1] : vector<16x32xf32> to vector<16xf32>
      %16 = vector.shape_cast %15 : vector<16xf32> to vector<16x1xf32>
      %cst_12 = arith.constant 3.125000e-02 : f32
      %17 = vector.broadcast %cst_12 : f32 to vector<16x1xf32>
      %18 = arith.mulf %13, %17 : vector<16x1xf32>
      %cst_13 = arith.constant 3.125000e-02 : f32
      %19 = vector.broadcast %cst_13 : f32 to vector<16x1xf32>
      %20 = arith.mulf %16, %19 : vector<16x1xf32>
      %21 = arith.mulf %18, %18 : vector<16x1xf32>
      %22 = arith.subf %20, %21 : vector<16x1xf32>
      %23 = vector.broadcast %18 : vector<16x1xf32> to vector<16x32xf32>
      %24 = arith.subf %11, %23 : vector<16x32xf32>
      %cst_14 = arith.constant 9.99999974E-6 : f32
      %25 = vector.broadcast %cst_14 : f32 to vector<16x1xf32>
      %26 = arith.addf %22, %25 : vector<16x1xf32>
      %27 = math.rsqrt %26 : vector<16x1xf32>
      %28 = vector.broadcast %27 : vector<16x1xf32> to vector<16x32xf32>
      %29 = arith.mulf %24, %28 : vector<16x32xf32>
      %c0_15 = arith.constant 0 : index
      %c0_16 = arith.constant 0 : index
      %30 = vector.load %arg5[%c0_15, %c0_16] : memref<1x32xf32, #tpu.memory_space<vmem>>, vector<1x32xf32>
      %31 = vector.broadcast %30 : vector<1x32xf32> to vector<16x32xf32>
      %32 = arith.mulf %29, %31 : vector<16x32xf32>
      %c0_17 = arith.constant 0 : index
      %c0_18 = arith.constant 0 : index
      %33 = vector.load %arg6[%c0_17, %c0_18] : memref<1x32xf32, #tpu.memory_space<vmem>>, vector<1x32xf32>
      %34 = vector.broadcast %33 : vector<1x32xf32> to vector<16x32xf32>
      %35 = arith.addf %32, %34 : vector<16x32xf32>
      %36 = arith.truncf %35 : vector<16x32xf32> to vector<16x32xbf16>
      %c0_19 = arith.constant 0 : index
      %c0_20 = arith.constant 0 : index
      %37 = vector.load %arg8[%c0_19, %c0_20] : memref<16x32xbf16, #tpu.memory_space<vmem>>, vector<16x32xbf16>
      tpu.vector_store %arg8[%c0_19, %c0_20], %36 {strides = array<i32>} : memref<16x32xbf16, #tpu.memory_space<vmem>>, vector<16x32xbf16>,
    } else {
    }
    %c0 = arith.constant 0 : index
    %c0_1 = arith.constant 0 : index
    %3 = vector.load %arg8[%c0, %c0_1] : memref<16x32xbf16, #tpu.memory_space<vmem>>, vector<16x32xbf16>
    %c0_2 = arith.constant 0 : index
    %c0_3 = arith.constant 0 : index
    %4 = vector.load %arg3[%c0_2, %c0_3] : memref<32x96xbf16, #tpu.memory_space<vmem>>, vector<32x96xbf16>
    %cst = arith.constant dense<0.000000e+00> : vector<16x96xf32>
    %5 = tpu.matmul %3, %4, %cst {dimension_numbers = #tpu.dot_dimension_numbers<[1], [0], [0], [1], [0, 0, 1, 1], [], []>} : vector<16x32xbf16>, vector<32x96xbf16>, vector<16x96xf32> -> vector<16x96xf32>
    %c0_4 = arith.constant 0 : index
    %c0_5 = arith.constant 0 : index
    %6 = vector.load %arg4[%c0_4, %c0_5] : memref<1x96xf32, #tpu.memory_space<vmem>>, vector<1x96xf32>
    %7 = vector.broadcast %6 : vector<1x96xf32> to vector<16x96xf32>
    %8 = arith.addf %5, %7 : vector<16x96xf32>
    %9 = arith.truncf %8 : vector<16x96xf32> to vector<16x96xbf16>
    %c0_6 = arith.constant 0 : index
    %c0_7 = arith.constant 0 : index
    %10 = vector.load %arg7[%c0_6, %c0_7] : memref<16x96xbf16, #tpu.memory_space<vmem>>, vector<16x96xbf16>
    tpu.vector_store %arg7[%c0_6, %c0_7], %9 {strides = array<i32>} : memref<16x96xbf16, #tpu.memory_space<vmem>>, vector<16x96xbf16>,
    return
  }
  func.func @transform_0(%arg0: i32, %arg1: i32) -> (i32, i32) {
    %c0_i32 = arith.constant 0 : i32
    %c0_i32_0 = arith.constant 0 : i32
    return %arg0, %c0_i32 : i32, i32
  }
  func.func @transform_1(%arg0: i32, %arg1: i32) -> (i32, i32) {
    %c0_i32 = arith.constant 0 : i32
    %c0_i32_0 = arith.constant 0 : i32
    return %c0_i32, %arg1 : i32, i32
  }
  func.func @transform_2(%arg0: i32, %arg1: i32) -> (i32, i32) {
    %c0_i32 = arith.constant 0 : i32
    %c0_i32_0 = arith.constant 0 : i32
    return %c0_i32, %arg1 : i32, i32
  }
  func.func @transform_3(%arg0: i32, %arg1: i32) -> (i32, i32) {
    %c0_i32 = arith.constant 0 : i32
    %c0_i32_0 = arith.constant 0 : i32
    %c0_i32_1 = arith.constant 0 : i32
    return %c0_i32, %c0_i32_0 : i32, i32
  }
  func.func @transform_4(%arg0: i32, %arg1: i32) -> (i32, i32) {
    %c0_i32 = arith.constant 0 : i32
    %c0_i32_0 = arith.constant 0 : i32
    %c0_i32_1 = arith.constant 0 : i32
    return %c0_i32, %c0_i32_0 : i32, i32
  }
  func.func @transform_5(%arg0: i32, %arg1: i32) -> (i32, i32) {
    %c0_i32 = arith.constant 0 : i32
    return %arg0, %arg1 : i32, i32
  }
}

module attributes {stable_mosaic.version = 11 : i64} {
  func.func @_flash_attn_kernel(%arg0: i32, %arg1: i32, %arg2: i32, %arg3: i32, %arg4: memref<1x1x1x8x8xbf16, #tpu.memory_space<vmem>>, %arg5: memref<1x1x1x8x8xbf16, #tpu.memory_space<vmem>>, %arg6: memref<1x1x1x8x8xbf16, #tpu.memory_space<vmem>>, %arg7: memref<1x1x8x8xbf16, #tpu.memory_space<vmem>>, %arg8: memref<8x1xf32, #tpu.memory_space<vmem>>, %arg9: memref<8x1xf32, #tpu.memory_space<vmem>>, %arg10: memref<8x8xf32, #tpu.memory_space<vmem>>) attributes {dimension_semantics = [#tpu.dimension_semantics<parallel>, #tpu.dimension_semantics<parallel>, #tpu.dimension_semantics<parallel>, #tpu.dimension_semantics<arbitrary>], iteration_bounds = array<i64: 2, 4, 1, 1>, scalar_prefetch = 0 : i64, scratch_operands = 3 : i64, tpu.core_type = #tpu.core_type<tc>, window_params = [{transform_indices = @transform_0, window_bounds = array<i64: 1, 1, 1, 8, 8>}, {transform_indices = @transform_1, window_bounds = array<i64: 1, 1, 1, 8, 8>}, {transform_indices = @transform_2, window_bounds = array<i64: 1, 1, 1, 8, 8>}, {transform_indices = @transform_3, window_bounds = array<i64: 1, 1, 8, 8>}]} {
    %c0_i32 = arith.constant 0 : i32
    %0 = arith.cmpi eq, %arg3, %c0_i32 : i32
    %1 = arith.extui %0 : i1 to i32
    %c0_i32_0 = arith.constant 0 : i32
    %2 = arith.cmpi ne, %1, %c0_i32_0 : i32
    scf.if %2 {
      %cst = arith.constant 0xFF800000 : f32
      %13 = vector.broadcast %cst : f32 to vector<8x1xf32>
      %c0 = arith.constant 0 : index
      %c0_6 = arith.constant 0 : index
      %14 = vector.load %arg8[%c0, %c0_6] : memref<8x1xf32, #tpu.memory_space<vmem>>, vector<8x1xf32>
      tpu.vector_store %arg8[%c0, %c0_6], %13 {strides = array<i32>} : memref<8x1xf32, #tpu.memory_space<vmem>>, vector<8x1xf32>,
      %cst_7 = arith.constant 0.000000e+00 : f32
      %15 = vector.broadcast %cst_7 : f32 to vector<8x1xf32>
      %c0_8 = arith.constant 0 : index
      %c0_9 = arith.constant 0 : index
      %16 = vector.load %arg9[%c0_8, %c0_9] : memref<8x1xf32, #tpu.memory_space<vmem>>, vector<8x1xf32>
      tpu.vector_store %arg9[%c0_8, %c0_9], %15 {strides = array<i32>} : memref<8x1xf32, #tpu.memory_space<vmem>>, vector<8x1xf32>,
      %cst_10 = arith.constant 0.000000e+00 : f32
      %17 = vector.broadcast %cst_10 : f32 to vector<8x8xf32>
      %c0_11 = arith.constant 0 : index
      %c0_12 = arith.constant 0 : index
      %18 = vector.load %arg10[%c0_11, %c0_12] : memref<8x8xf32, #tpu.memory_space<vmem>>, vector<8x8xf32>
      tpu.vector_store %arg10[%c0_11, %c0_12], %17 {strides = array<i32>} : memref<8x8xf32, #tpu.memory_space<vmem>>, vector<8x8xf32>,
    } else {
    }
    %c8_i32 = arith.constant 8 : i32
    %3 = arith.muli %arg2, %c8_i32 : i32
    %c8_i32_1 = arith.constant 8 : i32
    %4 = arith.muli %arg3, %c8_i32_1 : i32
    %c8_i32_2 = arith.constant 8 : i32
    %5 = arith.addi %3, %c8_i32_2 : i32
    %c1_i32 = arith.constant 1 : i32
    %6 = arith.subi %5, %c1_i32 : i32
    %7 = arith.cmpi sle, %4, %6 : i32
    %8 = arith.extui %7 : i1 to i32
    %c0_i32_3 = arith.constant 0 : i32
    %9 = arith.cmpi ne, %8, %c0_i32_3 : i32
    scf.if %9 {
      %c0 = arith.constant 0 : index
      %c0_6 = arith.constant 0 : index
      %c0_7 = arith.constant 0 : index
      %c0_8 = arith.constant 0 : index
      %c0_9 = arith.constant 0 : index
      %13 = vector.load %arg4[%c0, %c0_6, %c0_7, %c0_8, %c0_9] : memref<1x1x1x8x8xbf16, #tpu.memory_space<vmem>>, vector<1x1x1x8x8xbf16>
      %14 = vector.shape_cast %13 : vector<1x1x1x8x8xbf16> to vector<8x8xbf16>
      %cst = arith.constant 3.535160e-01 : bf16
      %15 = vector.broadcast %cst : bf16 to vector<8x8xbf16>
      %16 = arith.mulf %14, %15 : vector<8x8xbf16>
      %c0_10 = arith.constant 0 : index
      %c0_11 = arith.constant 0 : index
      %c0_12 = arith.constant 0 : index
      %c0_13 = arith.constant 0 : index
      %c0_14 = arith.constant 0 : index
      %17 = vector.load %arg5[%c0_10, %c0_11, %c0_12, %c0_13, %c0_14] : memref<1x1x1x8x8xbf16, #tpu.memory_space<vmem>>, vector<1x1x1x8x8xbf16>
      %18 = vector.shape_cast %17 : vector<1x1x1x8x8xbf16> to vector<8x8xbf16>
      %cst_15 = arith.constant dense<0.000000e+00> : vector<8x8xf32>
      %19 = tpu.matmul %16, %18, %cst_15 {dimension_numbers = #tpu.dot_dimension_numbers<[1], [1], [0], [0], [0, 0, 1, 0], [], []>} : vector<8x8xbf16>, vector<8x8xbf16>, vector<8x8xf32> -> vector<8x8xf32>
      %20 = tpu.iota {dimensions = array<i32: 0>} : vector<8x8xi32>
      %21 = vector.broadcast %3 : i32 to vector<8x8xi32>
      %22 = arith.addi %20, %21 : vector<8x8xi32>
      %23 = tpu.iota {dimensions = array<i32: 1>} : vector<8x8xi32>
      %24 = vector.broadcast %4 : i32 to vector<8x8xi32>
      %25 = arith.addi %23, %24 : vector<8x8xi32>
      %26 = arith.cmpi sle, %25, %22 : vector<8x8xi32>
      %cst_16 = arith.constant -1.000000e+30 : f32
      %27 = vector.broadcast %cst_16 : f32 to vector<8x8xf32>
      %28 = arith.select %26, %19, %27 : vector<8x8xi1>, vector<8x8xf32>
      %c0_17 = arith.constant 0 : index
      %c0_18 = arith.constant 0 : index
      %29 = vector.load %arg8[%c0_17, %c0_18] : memref<8x1xf32, #tpu.memory_space<vmem>>, vector<8x1xf32>
      %cst_19 = arith.constant dense<0xFF800000> : vector<8xf32>
      %30 = vector.multi_reduction <maximumf>, %28, %cst_19 [1] : vector<8x8xf32> to vector<8xf32>
      %31 = vector.shape_cast %30 : vector<8xf32> to vector<8x1xf32>
      %32 = arith.maximumf %29, %31 : vector<8x1xf32>
      %33 = arith.subf %29, %32 : vector<8x1xf32>
      %34 = math.exp %33 : vector<8x1xf32>
      %35 = vector.broadcast %32 : vector<8x1xf32> to vector<8x8xf32>
      %36 = arith.subf %28, %35 : vector<8x8xf32>
      %37 = math.exp %36 : vector<8x8xf32>
      %c0_20 = arith.constant 0 : index
      %c0_21 = arith.constant 0 : index
      %38 = vector.load %arg9[%c0_20, %c0_21] : memref<8x1xf32, #tpu.memory_space<vmem>>, vector<8x1xf32>
      %39 = arith.mulf %34, %38 : vector<8x1xf32>
      %cst_22 = arith.constant dense<0.000000e+00> : vector<8xf32>
      %40 = vector.multi_reduction <add>, %37, %cst_22 [1] : vector<8x8xf32> to vector<8xf32>
      %41 = vector.shape_cast %40 : vector<8xf32> to vector<8x1xf32>
      %42 = arith.addf %39, %41 : vector<8x1xf32>
      %c0_23 = arith.constant 0 : index
      %c0_24 = arith.constant 0 : index
      %43 = vector.load %arg9[%c0_23, %c0_24] : memref<8x1xf32, #tpu.memory_space<vmem>>, vector<8x1xf32>
      tpu.vector_store %arg9[%c0_23, %c0_24], %42 {strides = array<i32>} : memref<8x1xf32, #tpu.memory_space<vmem>>, vector<8x1xf32>,
      %c0_25 = arith.constant 0 : index
      %c0_26 = arith.constant 0 : index
      %44 = vector.load %arg10[%c0_25, %c0_26] : memref<8x8xf32, #tpu.memory_space<vmem>>, vector<8x8xf32>
      %45 = vector.broadcast %34 : vector<8x1xf32> to vector<8x8xf32>
      %46 = arith.mulf %45, %44 : vector<8x8xf32>
      %47 = arith.truncf %37 : vector<8x8xf32> to vector<8x8xbf16>
      %c0_27 = arith.constant 0 : index
      %c0_28 = arith.constant 0 : index
      %c0_29 = arith.constant 0 : index
      %c0_30 = arith.constant 0 : index
      %c0_31 = arith.constant 0 : index
      %48 = vector.load %arg6[%c0_27, %c0_28, %c0_29, %c0_30, %c0_31] : memref<1x1x1x8x8xbf16, #tpu.memory_space<vmem>>, vector<1x1x1x8x8xbf16>
      %49 = vector.shape_cast %48 : vector<1x1x1x8x8xbf16> to vector<8x8xbf16>
      %cst_32 = arith.constant dense<0.000000e+00> : vector<8x8xf32>
      %50 = tpu.matmul %47, %49, %cst_32 {dimension_numbers = #tpu.dot_dimension_numbers<[1], [0], [0], [1], [0, 0, 1, 1], [], []>} : vector<8x8xbf16>, vector<8x8xbf16>, vector<8x8xf32> -> vector<8x8xf32>
      %51 = arith.addf %46, %50 : vector<8x8xf32>
      %c0_33 = arith.constant 0 : index
      %c0_34 = arith.constant 0 : index
      %52 = vector.load %arg10[%c0_33, %c0_34] : memref<8x8xf32, #tpu.memory_space<vmem>>, vector<8x8xf32>
      tpu.vector_store %arg10[%c0_33, %c0_34], %51 {strides = array<i32>} : memref<8x8xf32, #tpu.memory_space<vmem>>, vector<8x8xf32>,
      %c0_35 = arith.constant 0 : index
      %c0_36 = arith.constant 0 : index
      %53 = vector.load %arg8[%c0_35, %c0_36] : memref<8x1xf32, #tpu.memory_space<vmem>>, vector<8x1xf32>
      tpu.vector_store %arg8[%c0_35, %c0_36], %32 {strides = array<i32>} : memref<8x1xf32, #tpu.memory_space<vmem>>, vector<8x1xf32>,
    } else {
    }
    %c0_i32_4 = arith.constant 0 : i32
    %10 = arith.cmpi eq, %arg3, %c0_i32_4 : i32
    %11 = arith.extui %10 : i1 to i32
    %c0_i32_5 = arith.constant 0 : i32
    %12 = arith.cmpi ne, %11, %c0_i32_5 : i32
    scf.if %12 {
      %c0 = arith.constant 0 : index
      %c0_6 = arith.constant 0 : index
      %13 = vector.load %arg9[%c0, %c0_6] : memref<8x1xf32, #tpu.memory_space<vmem>>, vector<8x1xf32>
      %14 = tpu.reciprocal %13 {approx = true} : vector<8x1xf32> -> vector<8x1xf32>
      %c0_7 = arith.constant 0 : index
      %c0_8 = arith.constant 0 : index
      %15 = vector.load %arg10[%c0_7, %c0_8] : memref<8x8xf32, #tpu.memory_space<vmem>>, vector<8x8xf32>
      %16 = vector.broadcast %14 : vector<8x1xf32> to vector<8x8xf32>
      %17 = arith.mulf %15, %16 : vector<8x8xf32>
      %18 = arith.truncf %17 : vector<8x8xf32> to vector<8x8xbf16>
      %c0_9 = arith.constant 0 : index
      %c0_10 = arith.constant 0 : index
      %c0_11 = arith.constant 0 : index
      %c0_12 = arith.constant 0 : index
      %19 = vector.load %arg7[%c0_9, %c0_10, %c0_11, %c0_12] : memref<1x1x8x8xbf16, #tpu.memory_space<vmem>>, vector<1x1x8x8xbf16>
      %20 = vector.shape_cast %19 : vector<1x1x8x8xbf16> to vector<8x8xbf16>
      %21 = vector.shape_cast %18 : vector<8x8xbf16> to vector<1x1x8x8xbf16>
      tpu.vector_store %arg7[%c0_9, %c0_10, %c0_11, %c0_12], %21 {strides = array<i32>} : memref<1x1x8x8xbf16, #tpu.memory_space<vmem>>, vector<1x1x8x8xbf16>,
    } else {
    }
    return
  }
  func.func @transform_0(%arg0: i32, %arg1: i32, %arg2: i32, %arg3: i32) -> (i32, i32, i32, i32, i32) {
    %c0_i32 = arith.constant 0 : i32
    %c0_i32_0 = arith.constant 0 : i32
    %c0_i32_1 = arith.constant 0 : i32
    return %arg0, %c0_i32, %arg1, %arg2, %c0_i32_0 : i32, i32, i32, i32, i32
  }
  func.func @transform_1(%arg0: i32, %arg1: i32, %arg2: i32, %arg3: i32) -> (i32, i32, i32, i32, i32) {
    %c1_i32 = arith.constant 1 : i32
    %c0_i32 = arith.constant 0 : i32
    %c0_i32_0 = arith.constant 0 : i32
    return %arg0, %c1_i32, %arg1, %arg3, %c0_i32 : i32, i32, i32, i32, i32
  }
  func.func @transform_2(%arg0: i32, %arg1: i32, %arg2: i32, %arg3: i32) -> (i32, i32, i32, i32, i32) {
    %c2_i32 = arith.constant 2 : i32
    %c0_i32 = arith.constant 0 : i32
    %c0_i32_0 = arith.constant 0 : i32
    return %arg0, %c2_i32, %arg1, %arg3, %c0_i32 : i32, i32, i32, i32, i32
  }
  func.func @transform_3(%arg0: i32, %arg1: i32, %arg2: i32, %arg3: i32) -> (i32, i32, i32, i32) {
    %c0_i32 = arith.constant 0 : i32
    %c0_i32_0 = arith.constant 0 : i32
    return %arg0, %arg1, %arg2, %c0_i32 : i32, i32, i32, i32
  }
}

module attributes {stable_mosaic.version = 11 : i64} {
  func.func @_fused_linear_kernel(%arg0: i32, %arg1: i32, %arg2: memref<16x32xbf16, #tpu.memory_space<vmem>>, %arg3: memref<32x32xbf16, #tpu.memory_space<vmem>>, %arg4: memref<1x32xf32, #tpu.memory_space<vmem>>, %arg5: memref<16x32xf32, #tpu.memory_space<vmem>>, %arg6: memref<16x32xf32, #tpu.memory_space<vmem>>) attributes {dimension_semantics = [#tpu.dimension_semantics<parallel>, #tpu.dimension_semantics<arbitrary>], iteration_bounds = array<i64: 1, 1>, scalar_prefetch = 0 : i64, scratch_operands = 0 : i64, tpu.core_type = #tpu.core_type<tc>, window_params = [{transform_indices = @transform_0, window_bounds = array<i64: 16, 32>}, {transform_indices = @transform_1, window_bounds = array<i64: 32, 32>}, {transform_indices = @transform_2, window_bounds = array<i64: 1, 32>}, {transform_indices = @transform_3, window_bounds = array<i64: 16, 32>}, {transform_indices = @transform_4, window_bounds = array<i64: 16, 32>}]} {
    %c0 = arith.constant 0 : index
    %c0_0 = arith.constant 0 : index
    %0 = vector.load %arg2[%c0, %c0_0] : memref<16x32xbf16, #tpu.memory_space<vmem>>, vector<16x32xbf16>
    %c0_1 = arith.constant 0 : index
    %c0_2 = arith.constant 0 : index
    %1 = vector.load %arg3[%c0_1, %c0_2] : memref<32x32xbf16, #tpu.memory_space<vmem>>, vector<32x32xbf16>
    %cst = arith.constant dense<0.000000e+00> : vector<16x32xf32>
    %2 = tpu.matmul %0, %1, %cst {dimension_numbers = #tpu.dot_dimension_numbers<[1], [0], [0], [1], [0, 0, 1, 1], [], []>} : vector<16x32xbf16>, vector<32x32xbf16>, vector<16x32xf32> -> vector<16x32xf32>
    %c0_3 = arith.constant 0 : index
    %c0_4 = arith.constant 0 : index
    %3 = vector.load %arg4[%c0_3, %c0_4] : memref<1x32xf32, #tpu.memory_space<vmem>>, vector<1x32xf32>
    %4 = vector.broadcast %3 : vector<1x32xf32> to vector<16x32xf32>
    %5 = arith.addf %2, %4 : vector<16x32xf32>
    %c0_5 = arith.constant 0 : index
    %c0_6 = arith.constant 0 : index
    %6 = vector.load %arg5[%c0_5, %c0_6] : memref<16x32xf32, #tpu.memory_space<vmem>>, vector<16x32xf32>
    %7 = arith.addf %5, %6 : vector<16x32xf32>
    %c0_7 = arith.constant 0 : index
    %c0_8 = arith.constant 0 : index
    %8 = vector.load %arg6[%c0_7, %c0_8] : memref<16x32xf32, #tpu.memory_space<vmem>>, vector<16x32xf32>
    tpu.vector_store %arg6[%c0_7, %c0_8], %7 {strides = array<i32>} : memref<16x32xf32, #tpu.memory_space<vmem>>, vector<16x32xf32>,
    return
  }
  func.func @transform_0(%arg0: i32, %arg1: i32) -> (i32, i32) {
    %c0_i32 = arith.constant 0 : i32
    %c0_i32_0 = arith.constant 0 : i32
    return %arg0, %c0_i32 : i32, i32
  }
  func.func @transform_1(%arg0: i32, %arg1: i32) -> (i32, i32) {
    %c0_i32 = arith.constant 0 : i32
    %c0_i32_0 = arith.constant 0 : i32
    return %c0_i32, %arg1 : i32, i32
  }
  func.func @transform_2(%arg0: i32, %arg1: i32) -> (i32, i32) {
    %c0_i32 = arith.constant 0 : i32
    %c0_i32_0 = arith.constant 0 : i32
    return %c0_i32, %arg1 : i32, i32
  }
  func.func @transform_3(%arg0: i32, %arg1: i32) -> (i32, i32) {
    %c0_i32 = arith.constant 0 : i32
    return %arg0, %arg1 : i32, i32
  }
  func.func @transform_4(%arg0: i32, %arg1: i32) -> (i32, i32) {
    %c0_i32 = arith.constant 0 : i32
    return %arg0, %arg1 : i32, i32
  }
}

module attributes {stable_mosaic.version = 11 : i64} {
  func.func @_fused_linear_kernel(%arg0: i32, %arg1: i32, %arg2: memref<16x32xf32, #tpu.memory_space<vmem>>, %arg3: memref<32x128xbf16, #tpu.memory_space<vmem>>, %arg4: memref<1x128xf32, #tpu.memory_space<vmem>>, %arg5: memref<1x32xf32, #tpu.memory_space<vmem>>, %arg6: memref<1x32xf32, #tpu.memory_space<vmem>>, %arg7: memref<16x128xbf16, #tpu.memory_space<vmem>>, %arg8: memref<16x32xbf16, #tpu.memory_space<vmem>>) attributes {dimension_semantics = [#tpu.dimension_semantics<parallel>, #tpu.dimension_semantics<arbitrary>], iteration_bounds = array<i64: 1, 1>, scalar_prefetch = 0 : i64, scratch_operands = 1 : i64, tpu.core_type = #tpu.core_type<tc>, window_params = [{transform_indices = @transform_0, window_bounds = array<i64: 16, 32>}, {transform_indices = @transform_1, window_bounds = array<i64: 32, 128>}, {transform_indices = @transform_2, window_bounds = array<i64: 1, 128>}, {pipeline_mode = #tpu.pipeline_mode<synchronous>, transform_indices = @transform_3, window_bounds = array<i64: 1, 32>}, {pipeline_mode = #tpu.pipeline_mode<synchronous>, transform_indices = @transform_4, window_bounds = array<i64: 1, 32>}, {transform_indices = @transform_5, window_bounds = array<i64: 16, 128>}]} {
    %c0_i32 = arith.constant 0 : i32
    %0 = arith.cmpi eq, %arg1, %c0_i32 : i32
    %1 = arith.extui %0 : i1 to i32
    %c0_i32_0 = arith.constant 0 : i32
    %2 = arith.cmpi ne, %1, %c0_i32_0 : i32
    scf.if %2 {
      %c0_12 = arith.constant 0 : index
      %c0_13 = arith.constant 0 : index
      %24 = vector.load %arg2[%c0_12, %c0_13] : memref<16x32xf32, #tpu.memory_space<vmem>>, vector<16x32xf32>
      %cst_14 = arith.constant dense<0.000000e+00> : vector<16xf32>
      %25 = vector.multi_reduction <add>, %24, %cst_14 [1] : vector<16x32xf32> to vector<16xf32>
      %26 = vector.shape_cast %25 : vector<16xf32> to vector<16x1xf32>
      %27 = arith.mulf %24, %24 : vector<16x32xf32>
      %cst_15 = arith.constant dense<0.000000e+00> : vector<16xf32>
      %28 = vector.multi_reduction <add>, %27, %cst_15 [1] : vector<16x32xf32> to vector<16xf32>
      %29 = vector.shape_cast %28 : vector<16xf32> to vector<16x1xf32>
      %cst_16 = arith.constant 3.125000e-02 : f32
      %30 = vector.broadcast %cst_16 : f32 to vector<16x1xf32>
      %31 = arith.mulf %26, %30 : vector<16x1xf32>
      %cst_17 = arith.constant 3.125000e-02 : f32
      %32 = vector.broadcast %cst_17 : f32 to vector<16x1xf32>
      %33 = arith.mulf %29, %32 : vector<16x1xf32>
      %34 = arith.mulf %31, %31 : vector<16x1xf32>
      %35 = arith.subf %33, %34 : vector<16x1xf32>
      %36 = vector.broadcast %31 : vector<16x1xf32> to vector<16x32xf32>
      %37 = arith.subf %24, %36 : vector<16x32xf32>
      %cst_18 = arith.constant 9.99999974E-6 : f32
      %38 = vector.broadcast %cst_18 : f32 to vector<16x1xf32>
      %39 = arith.addf %35, %38 : vector<16x1xf32>
      %40 = math.rsqrt %39 : vector<16x1xf32>
      %41 = vector.broadcast %40 : vector<16x1xf32> to vector<16x32xf32>
      %42 = arith.mulf %37, %41 : vector<16x32xf32>
      %c0_19 = arith.constant 0 : index
      %c0_20 = arith.constant 0 : index
      %43 = vector.load %arg5[%c0_19, %c0_20] : memref<1x32xf32, #tpu.memory_space<vmem>>, vector<1x32xf32>
      %44 = vector.broadcast %43 : vector<1x32xf32> to vector<16x32xf32>
      %45 = arith.mulf %42, %44 : vector<16x32xf32>
      %c0_21 = arith.constant 0 : index
      %c0_22 = arith.constant 0 : index
      %46 = vector.load %arg6[%c0_21, %c0_22] : memref<1x32xf32, #tpu.memory_space<vmem>>, vector<1x32xf32>
      %47 = vector.broadcast %46 : vector<1x32xf32> to vector<16x32xf32>
      %48 = arith.addf %45, %47 : vector<16x32xf32>
      %49 = arith.truncf %48 : vector<16x32xf32> to vector<16x32xbf16>
      %c0_23 = arith.constant 0 : index
      %c0_24 = arith.constant 0 : index
      %50 = vector.load %arg8[%c0_23, %c0_24] : memref<16x32xbf16, #tpu.memory_space<vmem>>, vector<16x32xbf16>
      tpu.vector_store %arg8[%c0_23, %c0_24], %49 {strides = array<i32>} : memref<16x32xbf16, #tpu.memory_space<vmem>>, vector<16x32xbf16>,
    } else {
    }
    %c0 = arith.constant 0 : index
    %c0_1 = arith.constant 0 : index
    %3 = vector.load %arg8[%c0, %c0_1] : memref<16x32xbf16, #tpu.memory_space<vmem>>, vector<16x32xbf16>
    %c0_2 = arith.constant 0 : index
    %c0_3 = arith.constant 0 : index
    %4 = vector.load %arg3[%c0_2, %c0_3] : memref<32x128xbf16, #tpu.memory_space<vmem>>, vector<32x128xbf16>
    %cst = arith.constant dense<0.000000e+00> : vector<16x128xf32>
    %5 = tpu.matmul %3, %4, %cst {dimension_numbers = #tpu.dot_dimension_numbers<[1], [0], [0], [1], [0, 0, 1, 1], [], []>} : vector<16x32xbf16>, vector<32x128xbf16>, vector<16x128xf32> -> vector<16x128xf32>
    %c0_4 = arith.constant 0 : index
    %c0_5 = arith.constant 0 : index
    %6 = vector.load %arg4[%c0_4, %c0_5] : memref<1x128xf32, #tpu.memory_space<vmem>>, vector<1x128xf32>
    %7 = vector.broadcast %6 : vector<1x128xf32> to vector<16x128xf32>
    %8 = arith.addf %5, %7 : vector<16x128xf32>
    %cst_6 = arith.constant 5.000000e-01 : f32
    %9 = vector.broadcast %cst_6 : f32 to vector<16x128xf32>
    %10 = arith.mulf %9, %8 : vector<16x128xf32>
    %cst_7 = arith.constant 4.471500e-02 : f32
    %11 = vector.broadcast %cst_7 : f32 to vector<16x128xf32>
    %12 = arith.mulf %11, %8 : vector<16x128xf32>
    %13 = arith.mulf %12, %8 : vector<16x128xf32>
    %14 = arith.mulf %13, %8 : vector<16x128xf32>
    %15 = arith.addf %8, %14 : vector<16x128xf32>
    %cst_8 = arith.constant 0.797884583 : f32
    %16 = vector.broadcast %cst_8 : f32 to vector<16x128xf32>
    %17 = arith.mulf %16, %15 : vector<16x128xf32>
    %18 = math.tanh %17 : vector<16x128xf32>
    %cst_9 = arith.constant 1.000000e+00 : f32
    %19 = vector.broadcast %cst_9 : f32 to vector<16x128xf32>
    %20 = arith.addf %19, %18 : vector<16x128xf32>
    %21 = arith.mulf %10, %20 : vector<16x128xf32>
    %22 = arith.truncf %21 : vector<16x128xf32> to vector<16x128xbf16>
    %c0_10 = arith.constant 0 : index
    %c0_11 = arith.constant 0 : index
    %23 = vector.load %arg7[%c0_10, %c0_11] : memref<16x128xbf16, #tpu.memory_space<vmem>>, vector<16x128xbf16>
    tpu.vector_store %arg7[%c0_10, %c0_11], %22 {strides = array<i32>} : memref<16x128xbf16, #tpu.memory_space<vmem>>, vector<16x128xbf16>,
    return
  }
  func.func @transform_0(%arg0: i32, %arg1: i32) -> (i32, i32) {
    %c0_i32 = arith.constant 0 : i32
    %c0_i32_0 = arith.constant 0 : i32
    return %arg0, %c0_i32 : i32, i32
  }
  func.func @transform_1(%arg0: i32, %arg1: i32) -> (i32, i32) {
    %c0_i32 = arith.constant 0 : i32
    %c0_i32_0 = arith.constant 0 : i32
    return %c0_i32, %arg1 : i32, i32
  }
  func.func @transform_2(%arg0: i32, %arg1: i32) -> (i32, i32) {
    %c0_i32 = arith.constant 0 : i32
    %c0_i32_0 = arith.constant 0 : i32
    return %c0_i32, %arg1 : i32, i32
  }
  func.func @transform_3(%arg0: i32, %arg1: i32) -> (i32, i32) {
    %c0_i32 = arith.constant 0 : i32
    %c0_i32_0 = arith.constant 0 : i32
    %c0_i32_1 = arith.constant 0 : i32
    return %c0_i32, %c0_i32_0 : i32, i32
  }
  func.func @transform_4(%arg0: i32, %arg1: i32) -> (i32, i32) {
    %c0_i32 = arith.constant 0 : i32
    %c0_i32_0 = arith.constant 0 : i32
    %c0_i32_1 = arith.constant 0 : i32
    return %c0_i32, %c0_i32_0 : i32, i32
  }
  func.func @transform_5(%arg0: i32, %arg1: i32) -> (i32, i32) {
    %c0_i32 = arith.constant 0 : i32
    return %arg0, %arg1 : i32, i32
  }
}

module attributes {stable_mosaic.version = 11 : i64} {
  func.func @_fused_linear_kernel(%arg0: i32, %arg1: i32, %arg2: memref<16x128xbf16, #tpu.memory_space<vmem>>, %arg3: memref<128x32xbf16, #tpu.memory_space<vmem>>, %arg4: memref<1x32xf32, #tpu.memory_space<vmem>>, %arg5: memref<16x32xf32, #tpu.memory_space<vmem>>, %arg6: memref<16x32xf32, #tpu.memory_space<vmem>>) attributes {dimension_semantics = [#tpu.dimension_semantics<parallel>, #tpu.dimension_semantics<arbitrary>], iteration_bounds = array<i64: 1, 1>, scalar_prefetch = 0 : i64, scratch_operands = 0 : i64, tpu.core_type = #tpu.core_type<tc>, window_params = [{transform_indices = @transform_0, window_bounds = array<i64: 16, 128>}, {transform_indices = @transform_1, window_bounds = array<i64: 128, 32>}, {transform_indices = @transform_2, window_bounds = array<i64: 1, 32>}, {transform_indices = @transform_3, window_bounds = array<i64: 16, 32>}, {transform_indices = @transform_4, window_bounds = array<i64: 16, 32>}]} {
    %c0 = arith.constant 0 : index
    %c0_0 = arith.constant 0 : index
    %0 = vector.load %arg2[%c0, %c0_0] : memref<16x128xbf16, #tpu.memory_space<vmem>>, vector<16x128xbf16>
    %c0_1 = arith.constant 0 : index
    %c0_2 = arith.constant 0 : index
    %1 = vector.load %arg3[%c0_1, %c0_2] : memref<128x32xbf16, #tpu.memory_space<vmem>>, vector<128x32xbf16>
    %cst = arith.constant dense<0.000000e+00> : vector<16x32xf32>
    %2 = tpu.matmul %0, %1, %cst {dimension_numbers = #tpu.dot_dimension_numbers<[1], [0], [0], [1], [0, 0, 1, 1], [], []>} : vector<16x128xbf16>, vector<128x32xbf16>, vector<16x32xf32> -> vector<16x32xf32>
    %c0_3 = arith.constant 0 : index
    %c0_4 = arith.constant 0 : index
    %3 = vector.load %arg4[%c0_3, %c0_4] : memref<1x32xf32, #tpu.memory_space<vmem>>, vector<1x32xf32>
    %4 = vector.broadcast %3 : vector<1x32xf32> to vector<16x32xf32>
    %5 = arith.addf %2, %4 : vector<16x32xf32>
    %c0_5 = arith.constant 0 : index
    %c0_6 = arith.constant 0 : index
    %6 = vector.load %arg5[%c0_5, %c0_6] : memref<16x32xf32, #tpu.memory_space<vmem>>, vector<16x32xf32>
    %7 = arith.addf %5, %6 : vector<16x32xf32>
    %c0_7 = arith.constant 0 : index
    %c0_8 = arith.constant 0 : index
    %8 = vector.load %arg6[%c0_7, %c0_8] : memref<16x32xf32, #tpu.memory_space<vmem>>, vector<16x32xf32>
    tpu.vector_store %arg6[%c0_7, %c0_8], %7 {strides = array<i32>} : memref<16x32xf32, #tpu.memory_space<vmem>>, vector<16x32xf32>,
    return
  }
  func.func @transform_0(%arg0: i32, %arg1: i32) -> (i32, i32) {
    %c0_i32 = arith.constant 0 : i32
    %c0_i32_0 = arith.constant 0 : i32
    return %arg0, %c0_i32 : i32, i32
  }
  func.func @transform_1(%arg0: i32, %arg1: i32) -> (i32, i32) {
    %c0_i32 = arith.constant 0 : i32
    %c0_i32_0 = arith.constant 0 : i32
    return %c0_i32, %arg1 : i32, i32
  }
  func.func @transform_2(%arg0: i32, %arg1: i32) -> (i32, i32) {
    %c0_i32 = arith.constant 0 : i32
    %c0_i32_0 = arith.constant 0 : i32
    return %c0_i32, %arg1 : i32, i32
  }
  func.func @transform_3(%arg0: i32, %arg1: i32) -> (i32, i32) {
    %c0_i32 = arith.constant 0 : i32
    return %arg0, %arg1 : i32, i32
  }
  func.func @transform_4(%arg0: i32, %arg1: i32) -> (i32, i32) {
    %c0_i32 = arith.constant 0 : i32
    return %arg0, %arg1 : i32, i32
  }
}

module attributes {stable_mosaic.version = 11 : i64} {
  func.func @_lmhead_ce_kernel(%arg0: i32, %arg1: i32, %arg2: memref<16x32xf32, #tpu.memory_space<vmem>>, %arg3: memref<1x32xf32, #tpu.memory_space<vmem>>, %arg4: memref<1x32xf32, #tpu.memory_space<vmem>>, %arg5: memref<64x32xbf16, #tpu.memory_space<vmem>>, %arg6: memref<16x1xi32, #tpu.memory_space<vmem>>, %arg7: memref<16x1xf32, #tpu.memory_space<vmem>>, %arg8: memref<16x1xf32, #tpu.memory_space<vmem>>, %arg9: memref<16x32xbf16, #tpu.memory_space<vmem>>, %arg10: memref<16x1xf32, #tpu.memory_space<vmem>>, %arg11: memref<16x1xf32, #tpu.memory_space<vmem>>, %arg12: memref<16x1xf32, #tpu.memory_space<vmem>>) attributes {dimension_semantics = [#tpu.dimension_semantics<parallel>, #tpu.dimension_semantics<arbitrary>], iteration_bounds = array<i64: 1, 1>, scalar_prefetch = 0 : i64, scratch_operands = 4 : i64, tpu.core_type = #tpu.core_type<tc>, window_params = [{transform_indices = @transform_0, window_bounds = array<i64: 16, 32>}, {pipeline_mode = #tpu.pipeline_mode<synchronous>, transform_indices = @transform_1, window_bounds = array<i64: 1, 32>}, {pipeline_mode = #tpu.pipeline_mode<synchronous>, transform_indices = @transform_2, window_bounds = array<i64: 1, 32>}, {transform_indices = @transform_3, window_bounds = array<i64: 64, 32>}, {transform_indices = @transform_4, window_bounds = array<i64: 16, 1>}, {transform_indices = @transform_5, window_bounds = array<i64: 16, 1>}, {transform_indices = @transform_6, window_bounds = array<i64: 16, 1>}]} {
    %c0_i32 = arith.constant 0 : i32
    %0 = arith.cmpi eq, %arg1, %c0_i32 : i32
    %1 = arith.extui %0 : i1 to i32
    %c0_i32_0 = arith.constant 0 : i32
    %2 = arith.cmpi ne, %1, %c0_i32_0 : i32
    scf.if %2 {
      %c0_24 = arith.constant 0 : index
      %c0_25 = arith.constant 0 : index
      %39 = vector.load %arg2[%c0_24, %c0_25] : memref<16x32xf32, #tpu.memory_space<vmem>>, vector<16x32xf32>
      %cst_26 = arith.constant dense<0.000000e+00> : vector<16xf32>
      %40 = vector.multi_reduction <add>, %39, %cst_26 [1] : vector<16x32xf32> to vector<16xf32>
      %41 = vector.shape_cast %40 : vector<16xf32> to vector<16x1xf32>
      %42 = arith.mulf %39, %39 : vector<16x32xf32>
      %cst_27 = arith.constant dense<0.000000e+00> : vector<16xf32>
      %43 = vector.multi_reduction <add>, %42, %cst_27 [1] : vector<16x32xf32> to vector<16xf32>
      %44 = vector.shape_cast %43 : vector<16xf32> to vector<16x1xf32>
      %cst_28 = arith.constant 3.125000e-02 : f32
      %45 = vector.broadcast %cst_28 : f32 to vector<16x1xf32>
      %46 = arith.mulf %41, %45 : vector<16x1xf32>
      %cst_29 = arith.constant 3.125000e-02 : f32
      %47 = vector.broadcast %cst_29 : f32 to vector<16x1xf32>
      %48 = arith.mulf %44, %47 : vector<16x1xf32>
      %49 = arith.mulf %46, %46 : vector<16x1xf32>
      %50 = arith.subf %48, %49 : vector<16x1xf32>
      %51 = vector.broadcast %46 : vector<16x1xf32> to vector<16x32xf32>
      %52 = arith.subf %39, %51 : vector<16x32xf32>
      %cst_30 = arith.constant 9.99999974E-6 : f32
      %53 = vector.broadcast %cst_30 : f32 to vector<16x1xf32>
      %54 = arith.addf %50, %53 : vector<16x1xf32>
      %55 = math.rsqrt %54 : vector<16x1xf32>
      %56 = vector.broadcast %55 : vector<16x1xf32> to vector<16x32xf32>
      %57 = arith.mulf %52, %56 : vector<16x32xf32>
      %c0_31 = arith.constant 0 : index
      %c0_32 = arith.constant 0 : index
      %58 = vector.load %arg3[%c0_31, %c0_32] : memref<1x32xf32, #tpu.memory_space<vmem>>, vector<1x32xf32>
      %59 = vector.broadcast %58 : vector<1x32xf32> to vector<16x32xf32>
      %60 = arith.mulf %57, %59 : vector<16x32xf32>
      %c0_33 = arith.constant 0 : index
      %c0_34 = arith.constant 0 : index
      %61 = vector.load %arg4[%c0_33, %c0_34] : memref<1x32xf32, #tpu.memory_space<vmem>>, vector<1x32xf32>
      %62 = vector.broadcast %61 : vector<1x32xf32> to vector<16x32xf32>
      %63 = arith.addf %60, %62 : vector<16x32xf32>
      %64 = arith.truncf %63 : vector<16x32xf32> to vector<16x32xbf16>
      %c0_35 = arith.constant 0 : index
      %c0_36 = arith.constant 0 : index
      %65 = vector.load %arg9[%c0_35, %c0_36] : memref<16x32xbf16, #tpu.memory_space<vmem>>, vector<16x32xbf16>
      tpu.vector_store %arg9[%c0_35, %c0_36], %64 {strides = array<i32>} : memref<16x32xbf16, #tpu.memory_space<vmem>>, vector<16x32xbf16>,
      %cst_37 = arith.constant 0xFF800000 : f32
      %66 = vector.broadcast %cst_37 : f32 to vector<16x1xf32>
      %c0_38 = arith.constant 0 : index
      %c0_39 = arith.constant 0 : index
      %67 = vector.load %arg10[%c0_38, %c0_39] : memref<16x1xf32, #tpu.memory_space<vmem>>, vector<16x1xf32>
      tpu.vector_store %arg10[%c0_38, %c0_39], %66 {strides = array<i32>} : memref<16x1xf32, #tpu.memory_space<vmem>>, vector<16x1xf32>,
      %cst_40 = arith.constant 0.000000e+00 : f32
      %68 = vector.broadcast %cst_40 : f32 to vector<16x1xf32>
      %c0_41 = arith.constant 0 : index
      %c0_42 = arith.constant 0 : index
      %69 = vector.load %arg11[%c0_41, %c0_42] : memref<16x1xf32, #tpu.memory_space<vmem>>, vector<16x1xf32>
      tpu.vector_store %arg11[%c0_41, %c0_42], %68 {strides = array<i32>} : memref<16x1xf32, #tpu.memory_space<vmem>>, vector<16x1xf32>,
      %cst_43 = arith.constant 0.000000e+00 : f32
      %70 = vector.broadcast %cst_43 : f32 to vector<16x1xf32>
      %c0_44 = arith.constant 0 : index
      %c0_45 = arith.constant 0 : index
      %71 = vector.load %arg12[%c0_44, %c0_45] : memref<16x1xf32, #tpu.memory_space<vmem>>, vector<16x1xf32>
      tpu.vector_store %arg12[%c0_44, %c0_45], %70 {strides = array<i32>} : memref<16x1xf32, #tpu.memory_space<vmem>>, vector<16x1xf32>,
    } else {
    }
    %c0 = arith.constant 0 : index
    %c0_1 = arith.constant 0 : index
    %3 = vector.load %arg9[%c0, %c0_1] : memref<16x32xbf16, #tpu.memory_space<vmem>>, vector<16x32xbf16>
    %c0_2 = arith.constant 0 : index
    %c0_3 = arith.constant 0 : index
    %4 = vector.load %arg5[%c0_2, %c0_3] : memref<64x32xbf16, #tpu.memory_space<vmem>>, vector<64x32xbf16>
    %cst = arith.constant dense<0.000000e+00> : vector<16x64xf32>
    %5 = tpu.matmul %3, %4, %cst {dimension_numbers = #tpu.dot_dimension_numbers<[1], [1], [0], [0], [0, 0, 1, 0], [], []>} : vector<16x32xbf16>, vector<64x32xbf16>, vector<16x64xf32> -> vector<16x64xf32>
    %6 = tpu.iota {dimensions = array<i32: 1>} : vector<16x64xi32>
    %c64_i32 = arith.constant 64 : i32
    %7 = arith.muli %arg1, %c64_i32 : i32
    %8 = vector.broadcast %7 : i32 to vector<16x64xi32>
    %9 = arith.addi %6, %8 : vector<16x64xi32>
    %c0_4 = arith.constant 0 : index
    %c0_5 = arith.constant 0 : index
    %10 = vector.load %arg10[%c0_4, %c0_5] : memref<16x1xf32, #tpu.memory_space<vmem>>, vector<16x1xf32>
    %cst_6 = arith.constant dense<0xFF800000> : vector<16xf32>
    %11 = vector.multi_reduction <maximumf>, %5, %cst_6 [1] : vector<16x64xf32> to vector<16xf32>
    %12 = vector.shape_cast %11 : vector<16xf32> to vector<16x1xf32>
    %13 = arith.maximumf %10, %12 : vector<16x1xf32>
    %c0_7 = arith.constant 0 : index
    %c0_8 = arith.constant 0 : index
    %14 = vector.load %arg11[%c0_7, %c0_8] : memref<16x1xf32, #tpu.memory_space<vmem>>, vector<16x1xf32>
    %15 = arith.subf %10, %13 : vector<16x1xf32>
    %16 = math.exp %15 : vector<16x1xf32>
    %17 = arith.mulf %14, %16 : vector<16x1xf32>
    %18 = vector.broadcast %13 : vector<16x1xf32> to vector<16x64xf32>
    %19 = arith.subf %5, %18 : vector<16x64xf32>
    %20 = math.exp %19 : vector<16x64xf32>
    %cst_9 = arith.constant dense<0.000000e+00> : vector<16xf32>
    %21 = vector.multi_reduction <add>, %20, %cst_9 [1] : vector<16x64xf32> to vector<16xf32>
    %22 = vector.shape_cast %21 : vector<16xf32> to vector<16x1xf32>
    %23 = arith.addf %17, %22 : vector<16x1xf32>
    %c0_10 = arith.constant 0 : index
    %c0_11 = arith.constant 0 : index
    %24 = vector.load %arg11[%c0_10, %c0_11] : memref<16x1xf32, #tpu.memory_space<vmem>>, vector<16x1xf32>
    tpu.vector_store %arg11[%c0_10, %c0_11], %23 {strides = array<i32>} : memref<16x1xf32, #tpu.memory_space<vmem>>, vector<16x1xf32>,
    %c0_12 = arith.constant 0 : index
    %c0_13 = arith.constant 0 : index
    %25 = vector.load %arg10[%c0_12, %c0_13] : memref<16x1xf32, #tpu.memory_space<vmem>>, vector<16x1xf32>
    tpu.vector_store %arg10[%c0_12, %c0_13], %13 {strides = array<i32>} : memref<16x1xf32, #tpu.memory_space<vmem>>, vector<16x1xf32>,
    %c0_14 = arith.constant 0 : index
    %c0_15 = arith.constant 0 : index
    %26 = vector.load %arg6[%c0_14, %c0_15] : memref<16x1xi32, #tpu.memory_space<vmem>>, vector<16x1xi32>
    %27 = vector.broadcast %26 : vector<16x1xi32> to vector<16x64xi32>
    %28 = arith.cmpi eq, %9, %27 : vector<16x64xi32>
    %c0_16 = arith.constant 0 : index
    %c0_17 = arith.constant 0 : index
    %29 = vector.load %arg12[%c0_16, %c0_17] : memref<16x1xf32, #tpu.memory_space<vmem>>, vector<16x1xf32>
    %cst_18 = arith.constant 0.000000e+00 : f32
    %30 = vector.broadcast %cst_18 : f32 to vector<16x64xf32>
    %31 = arith.select %28, %5, %30 : vector<16x64xi1>, vector<16x64xf32>
    %cst_19 = arith.constant dense<0.000000e+00> : vector<16xf32>
    %32 = vector.multi_reduction <add>, %31, %cst_19 [1] : vector<16x64xf32> to vector<16xf32>
    %33 = vector.shape_cast %32 : vector<16xf32> to vector<16x1xf32>
    %34 = arith.addf %29, %33 : vector<16x1xf32>
    %c0_20 = arith.constant 0 : index
    %c0_21 = arith.constant 0 : index
    %35 = vector.load %arg12[%c0_20, %c0_21] : memref<16x1xf32, #tpu.memory_space<vmem>>, vector<16x1xf32>
    tpu.vector_store %arg12[%c0_20, %c0_21], %34 {strides = array<i32>} : memref<16x1xf32, #tpu.memory_space<vmem>>, vector<16x1xf32>,
    %c0_i32_22 = arith.constant 0 : i32
    %36 = arith.cmpi eq, %arg1, %c0_i32_22 : i32
    %37 = arith.extui %36 : i1 to i32
    %c0_i32_23 = arith.constant 0 : i32
    %38 = arith.cmpi ne, %37, %c0_i32_23 : i32
    scf.if %38 {
      %c0_24 = arith.constant 0 : index
      %c0_25 = arith.constant 0 : index
      %39 = vector.load %arg10[%c0_24, %c0_25] : memref<16x1xf32, #tpu.memory_space<vmem>>, vector<16x1xf32>
      %c0_26 = arith.constant 0 : index
      %c0_27 = arith.constant 0 : index
      %40 = vector.load %arg11[%c0_26, %c0_27] : memref<16x1xf32, #tpu.memory_space<vmem>>, vector<16x1xf32>
      %41 = math.log %40 : vector<16x1xf32>
      %42 = arith.addf %39, %41 : vector<16x1xf32>
      %c0_28 = arith.constant 0 : index
      %c0_29 = arith.constant 0 : index
      %43 = vector.load %arg12[%c0_28, %c0_29] : memref<16x1xf32, #tpu.memory_space<vmem>>, vector<16x1xf32>
      %44 = arith.subf %42, %43 : vector<16x1xf32>
      %c0_30 = arith.constant 0 : index
      %c0_31 = arith.constant 0 : index
      %45 = vector.load %arg7[%c0_30, %c0_31] : memref<16x1xf32, #tpu.memory_space<vmem>>, vector<16x1xf32>
      %46 = arith.mulf %44, %45 : vector<16x1xf32>
      %c0_32 = arith.constant 0 : index
      %c0_33 = arith.constant 0 : index
      %47 = vector.load %arg8[%c0_32, %c0_33] : memref<16x1xf32, #tpu.memory_space<vmem>>, vector<16x1xf32>
      tpu.vector_store %arg8[%c0_32, %c0_33], %46 {strides = array<i32>} : memref<16x1xf32, #tpu.memory_space<vmem>>, vector<16x1xf32>,
    } else {
    }
    return
  }
  func.func @transform_0(%arg0: i32, %arg1: i32) -> (i32, i32) {
    %c0_i32 = arith.constant 0 : i32
    %c0_i32_0 = arith.constant 0 : i32
    return %arg0, %c0_i32 : i32, i32
  }
  func.func @transform_1(%arg0: i32, %arg1: i32) -> (i32, i32) {
    %c0_i32 = arith.constant 0 : i32
    %c0_i32_0 = arith.constant 0 : i32
    %c0_i32_1 = arith.constant 0 : i32
    return %c0_i32, %c0_i32_0 : i32, i32
  }
  func.func @transform_2(%arg0: i32, %arg1: i32) -> (i32, i32) {
    %c0_i32 = arith.constant 0 : i32
    %c0_i32_0 = arith.constant 0 : i32
    %c0_i32_1 = arith.constant 0 : i32
    return %c0_i32, %c0_i32_0 : i32, i32
  }
  func.func @transform_3(%arg0: i32, %arg1: i32) -> (i32, i32) {
    %c0_i32 = arith.constant 0 : i32
    %c0_i32_0 = arith.constant 0 : i32
    return %arg1, %c0_i32 : i32, i32
  }
  func.func @transform_4(%arg0: i32, %arg1: i32) -> (i32, i32) {
    %c0_i32 = arith.constant 0 : i32
    %c0_i32_0 = arith.constant 0 : i32
    return %arg0, %c0_i32 : i32, i32
  }
  func.func @transform_5(%arg0: i32, %arg1: i32) -> (i32, i32) {
    %c0_i32 = arith.constant 0 : i32
    %c0_i32_0 = arith.constant 0 : i32
    return %arg0, %c0_i32 : i32, i32
  }
  func.func @transform_6(%arg0: i32, %arg1: i32) -> (i32, i32) {
    %c0_i32 = arith.constant 0 : i32
    %c0_i32_0 = arith.constant 0 : i32
    return %arg0, %c0_i32 : i32, i32
  }
}

</mosaic_0001>

<bundles_post_ra>
// kernel: gpt2_wrapper_forward.11
= control target key start
LH: loop header
LB: loop body
LE: loop exit
PB: predicated region body
PF: predicated region fallthrough
CT: control target
= control target key end

     0   :  { %vm27_vm0 = vcmask 261120   ;;  %v191_v9 = vmov 0.0   ;;  %vm192_vm1 = vmmov 0   ;;  %vm155_vm2 = vcmask 781312   ;;  %s256_s0 = inlined_call_operand.vmem [shape: f32[16,32], index: 0, kind: input, shape index: {}]   ;;  %s257_s1 = inlined_call_operand.vmem [shape: bf16[32,96], index: 1, kind: input, shape index: {}]   ;;  %s258_s3 = inlined_call_operand.vmem [shape: f32[1,32], index: 3, kind: input, shape index: {}]   ;;  %s259_s4 = inlined_call_operand.vmem [shape: f32[1,32], index: 4, kind: input, shape index: {}]   ;;  %s260_s2 = inlined_call_operand.vmem [shape: f32[1,96], index: 2, kind: input, shape index: {}]   ;;  %s261_s5 = inlined_call_operand.vmem [shape: bf16[16,96], index: 5, kind: output, shape index: {}]  }
   0x1   :  { %v25_v0 = vld [vmem:[%s256_s0] sm:$0xff]  ;;  %v26_v1 = vld [vmem:[%s256_s0 + $0x8] sm:$0xff]  ;;  %175 = vmatprep.subr.bf16.mxu0 %v191_v9  ;;  %179 = vmatprep.mubr.msk.bf16.mxu0 %vm192_vm1, %v191_v9 }
   0x2   :  { %v28_v2 = vsel %vm27_vm0, %v25_v0, 0.0  ;;  %v34_v3 = vmul.f32 %v25_v0, %v25_v0  ;;  %v35_v4 = vmul.f32 %v26_v1, %v26_v1  ;;  %v31_v6 = vsel %vm27_vm0, %v26_v1, 0.0  ;;  %v185_v8 = vld [vmem:[%s257_s1] sm:$0xff]   ;;  %v186_v10 = vld [vmem:[%s257_s1 + $0x8] sm:$0xff]  }
   0x3   :  { %29 = vadd.xlane.f32.xlu0 %v28_v2  ;;  %176 = vmatpush3.bf16.msra.mxu0 %v185_v8  ;;  %v162_v28 = vld [vmem:[%s258_s3] ss:$0 sm:$0xff] }
   0x4   :  { %v36_v5 = vsel %vm27_vm0, %v34_v3, 0.0  ;;  %v39_v7 = vsel %vm27_vm0, %v35_v4, 0.0  ;;  %177 = vmatprep.subr.bf16.mxu0 %v191_v9  ;;  %v163_v33 = vld [vmem:[%s259_s4] ss:$0 sm:$0xff] }
   0x5   :  { %37 = vadd.xlane.f32.xlu1 %v36_v5  ;;  %v164_v39 = vld [vmem:[%s260_s2] ss:$0 sm:$0xff] }
   0x7   :  { %32 = vadd.xlane.f32.xlu0 %v31_v6  ;;  %178 = vmatpush3.bf16.msra.mxu0 %v186_v10 }
   0x9   :  { %40 = vadd.xlane.f32.xlu1 %v39_v7 }
  0x90   :  { %v30_v11 = vpop.xlane.xlu0 %29 }
  0x91   :  { %v42_v12 = vmul.f32 0.03125, %v30_v11 }
  0x92   :  { %v38_v13 = vpop.xlane.xlu1 %37 }
  0x93   :  { %v46_v14 = vmul.f32 %v42_v12, %v42_v12  ;;  %v44_v15 = vmul.f32 0.03125, %v38_v13  ;;  %v50_v25 = vsub.f32 %v25_v0, %v42_v12 }
  0x94   :  { %v33_v16 = vpop.xlane.xlu0 %32 }
  0x95   :  { %v48_v17 = vsub.f32 %v44_v15, %v46_v14  ;;  %v43_v18 = vmul.f32 0.03125, %v33_v16 }
  0x96   :  { %v41_v19 = vpop.xlane.xlu1 %40 }
  0x97   :  { %v52_v20 = vadd.f32 1e-05, %v48_v17  ;;  %v47_v21 = vmul.f32 %v43_v18, %v43_v18  ;;  %v45_v22 = vmul.f32 0.03125, %v41_v19  ;;  %v51_v29 = vsub.f32 %v26_v1, %v43_v18 }
  0x99   :  { %187 = vrsqrt.f32 %v52_v20  ;;  %v49_v23 = vsub.f32 %v45_v22, %v47_v21 }
  0x9b   :  { %v53_v24 = vadd.f32 1e-05, %v49_v23 }
  0x9d   :  { %189 = vrsqrt.f32 %v53_v24 }
  0xa3   :  { %v188_v26 = vpop.eup %187 }
  0xa4   :  { %v56_v27 = vmul.f32 %v188_v26, %v50_v25 }
  0xa6   :  { %v65_v31 = vmul.f32 %v162_v28, %v56_v27 }
  0xa7   :  { %v190_v30 = vpop.eup %189 }
  0xa8   :  { %v57_v32 = vmul.f32 %v190_v30, %v51_v29  ;;  %v74_v35 = vadd.f32 %v163_v33, %v65_v31 }
  0xaa   :  { %v66_v34 = vmul.f32 %v162_v28, %v57_v32 }
  0xac   :  { %v75_v36 = vadd.f32 %v163_v33, %v66_v34 }
  0xae   :  { %v76_v37 = vpack.c.bf16 %v75_v36, %v74_v35 }
  0xb0   :  { %77 = vst.msk [vmem:[#allocation2] sm:$0xff] %vm27_vm0, %v76_v37 }
  0xb7   :  { %v78_v38 = vld [vmem:[#allocation2] sm:$0xff] }
  0xb8   :  { %180 = vmatmul.mubr.msk.bf16.vlgmr.msra.gmra.mrb[0].mxu0 %vm27_vm0, %v78_v38 }
 0x18b   :  { %v140_v40 = vpop.f32.mrb[0].mxu0 }
 0x18c   :  { %v141_v41 = vadd.f32 %v164_v39, %v140_v40  ;;  %v181_v42 = vpop.f32.mrb[1].mxu0 }
 0x18d   :  { %v143_v43 = vpop.f32.mrb[2].mxu0 }
 0x18e   :  { %v170_v44 = vpack.c.bf16 %v141_v41, %v141_v41  ;;  %v144_v45 = vadd.f32 %v164_v39, %v143_v43  ;;  %v182_v46 = vpop.f32.mrb[3].mxu0 }
 0x190   :  { %156 = vst.msk [vmem:[%s261_s5] sm:$0xf] %vm155_vm2, %v170_v44  ;;  %v171_v47 = vpack.c.bf16 %v144_v45, %v144_v45 }
 0x192   :  { %157 = vst.msk [vmem:[%s261_s5 + $0x4] sm:$0xf] %vm155_vm2, %v171_v47 }

// kernel: gpt2_wrapper_forward.12
= control target key start
LH: loop header
LB: loop body
LE: loop exit
PB: predicated region body
PF: predicated region fallthrough
CT: control target
= control target key end

     0   :  { %s803_s12 = smov 0   ;;  %s805_s13 = smov 0   ;;  %s884_s0 = inlined_call_operand.vmem [shape: bf16[2,3,4,8,8], index: 0, kind: input, shape index: {}, may-alias: {0,1,2}]   ;;  %s885_s1 = inlined_call_operand.vmem [shape: bf16[2,3,4,8,8], index: 1, kind: input, shape index: {}, may-alias: {0,1,2}]   ;;  %s886_s2 = inlined_call_operand.vmem [shape: bf16[2,3,4,8,8], index: 2, kind: input, shape index: {}, may-alias: {0,1,2}]   ;;  %s887_s3 = inlined_call_operand.vmem [shape: bf16[2,4,8,8], index: 3, kind: output, shape index: {}]  }
   0x1   :  { %s807_s14 = smov 0   ;;  %s809_s15 = smov 0  }
   0x2   :  { %s811_s16 = smov 0  }
   0x3 LB: > { %s35_s17 = sadd.s32 1, %s769_s14  ;;  %s39_s18 = sadd.s32 1, %s773_s15  ;;  %s777_s16 = sphi %s811_s16, %s13_s16   ;;  %s773_s15 = sphi %s809_s15, %s891_s15   ;;  %s769_s14 = sphi %s807_s14, %s890_s14   ;;  %s765_s13 = sphi %s805_s13, %s889_s13   ;;  %s761_s12 = sphi %s803_s12, %s888_s12  }
   0x4   : > { %p37_p0 = scmp.ge.s32.totalorder %s35_s17, 4  ;;  %p658_p1 = scmp.ge.s32.totalorder %s777_s16, 1 }
   0x5   : > { %p219_p2 = scmp.lt.s32.totalorder %s777_s16, 9 }
   0x6   : > { %s893_s17 = smov (%p37_p0, %s35_s17), 0  ;;  %s895_s18 = smov (!%p37_p0, %s39_s18), %s773_s15 }
   0x7   : > { %p220_p3 = pnand %p658_p1, %p219_p2  ;;  %p41_p4 = scmp.ge.s32.totalorder %s895_s18, 2 }
   0x8   : > { %p279_p5 = scmp.lt.s32.totalorder (!%p220_p3), %s765_s13, 1  ;;  %p281_p6 = scmp.lt.s32.totalorder (!%p220_p3), %s761_s12, 3  ;;  %vm334_vm0 = vcmask (!%p220_p3), 64512   ;;  %v779_v0 = vmov (!%p220_p3), 0.0   ;;  %vm780_vm1 = vmmov (!%p220_p3), 0   ;;  %vm331_vm2 = vcmask (!%p220_p3), 7168  }
   0x9   : > { %s897_s18 = smov (%p41_p4, %s895_s18), 0  ;;  %223 = sbr.rel (%p220_p3) target bundleno = 829 (0x33d), region = 32 }
   0xa   : > { %674 = vmatprep.subr.bf16.mxu0 (!%p220_p3), %v779_v0  ;;  %335 = vst.msk [vmem:[#allocation4] sm:$0xff] (!%p220_p3), %vm334_vm0, %v779_v0  ;;  %676 = vmatprep.mubr.msk.bf16.mxu0 (!%p220_p3), %vm780_vm1, %v779_v0  ;;  %v781_v5 = vmov (!%p220_p3), -inf   ;;  %v393_v6 = vlaneseq (!%p220_p3)  ;;  %v782_v15 = vmov (!%p220_p3), 0   ;;  %vm439_vm4 = vcmask (!%p220_p3), 1043456  }
   0xb   : > { %680 = vmatprep.subr.bf16.mxu1 (!%p220_p3), %v779_v0  ;;  %682 = vmatprep.mubr.msk.bf16.mxu1 (!%p220_p3), %vm780_vm1, %v779_v0  ;;  %332 = vst.msk [vmem:[#allocation2] sm:$0xff] (!%p220_p3), %vm331_vm2, %v781_v5  ;;  %333 = vst.msk [vmem:[#allocation3] sm:$0xff] (!%p220_p3), %vm331_vm2, %v779_v0  ;;  %vm499_vm5 = vcmask (!%p220_p3), 60416  }
   0xc   : > { %v394_v7 = vshrl.u32 (!%p220_p3), %v393_v6, 7  ;;  %v398_v8 = vand.u32 (!%p220_p3), 127, %v393_v6  ;;  %731 = vset.pattern.permute.xlu0 (!%p220_p3), %v782_v15  ;;  %732 = vset.pattern.permute.xlu1 (!%p220_p3), %v782_v15 }
   0xe   : > { %vm401_vm3 = vcmp.le.s32.totalorder (!%p220_p3), %v398_v8, %v394_v7 }
  0x10   : > { %s899_s13 = smov (!%p279_p5, %s765_s13), 1  ;;  %s901_s12 = smov (!%p281_p6, %s761_s12), 3 }
  0x11   : > { %s686_s19 = smul.u32 12, %s899_s13  ;;  %v427_v36 = vld [vmem:[#allocation4] sm:$0xff]  ;;  %s662_s4 = sshll.u32 %s899_s13, 2 }
  0x12   : > { %v403_v16 = vld [vmem:[#allocation2] sm:$0xff]  ;;  %v419_v30 = vld [vmem:[#allocation3] sm:$0xff]  ;;  %s322_s5 = sadd.s32 %s662_s4, %s901_s12 }
  0x13   : > { %s287_s20 = sadd.s32 %s686_s19, %s901_s12  ;;  %s663_s6 = sshll.u32 %s322_s5, 2 }
  0x14   : > { %s840_s21 = sshll.u32 %s287_s20, 2  ;;  %s324_s9 = scalar_lea.vmem %s887_s3, %s663_s6 }
  0x15   : > { %s289_s24 = scalar_lea.vmem %s884_s0, %s840_s21  ;;  %s582_s27 = scalar_lea.vmem %s885_s1, %s840_s21 }
  0x16   : > { %v664_v1 = vld [vmem:[%s582_s27 + $0x10] sm:$0xf]  ;;  %v343_v3 = vld [vmem:[%s289_s24] sm:$0xf]  ;;  %s588_s30 = scalar_lea.vmem %s886_s2, %s840_s21 }
  0x17   : > { %v351_v2 = vsel %vm334_vm0, %v664_v1, 0  ;;  %v344_v4 = vmul.bf16 1052065461, %v343_v3  ;;  %v666_v20 = vld [vmem:[%s588_s30 + $0x20] sm:$0xf] }
  0x18   : > { %675 = vmatpush3.bf16.xpose.msra.mxu0 %v351_v2  ;;  %v441_v21 = vsel %vm439_vm4, %v666_v20, 0 }
  0x19   : > { %681 = vmatpush3.bf16.msra.mxu1 %v441_v21 }
  0x1f   : > { %677 = vmatmul.mubr.msk.bf16.vlgmr.msra.gmra.mrb[0].mxu0 %vm334_vm0, %v344_v4 }
  0xf2   : > { %v387_v9 = vpop.f32.mrb[0].mxu0 }
  0xf3   : > { %v402_v10 = vsel %vm401_vm3, %v387_v9, -1e+30  ;;  %v678_v11 = vpop.f32.mrb[1].mxu0 }
  0xf4   : > { %v390_v12 = vpop.f32.mrb[2].mxu0  ;;  %v404_v13 = vsel %vm334_vm0, %v402_v10, -inf }
  0xf5   : > { %405 = vmax.xlane.f32.xlu0 %v404_v13  ;;  %v679_v14 = vpop.f32.mrb[3].mxu0 }
 0x182   : > { %v406_v17 = vpop.xlane.xlu0 %405 }
 0x183   : > { %v407_v18 = vmax.f32 %v403_v16, %v406_v17 }
 0x185   : > { %v408_v19 = vsub.f32 %v403_v16, %v407_v18  ;;  %485 = vst.msk [vmem:[#allocation2] sm:$0xff] %vm331_vm2, %v407_v18  ;;  %413 = vperm.xlu0 %731, %v407_v18  }
 0x187   : > { %v409_v28 = vmul.f32 1.442695, %v408_v19 }
 0x204   : > { %v414_v22 = vpop.permute.xlu0 %413 }
 0x205   : > { %v416_v23 = vsub.f32 %v402_v10, %v414_v22 }
 0x207   : > { %v417_v24 = vmul.f32 1.442695, %v416_v23 }
 0x209   : > { %733 = vpow2.f32 %v417_v24 }
 0x20a   : > { %735 = vpow2.f32 %v409_v28 }
 0x213   : > { %v734_v25 = vpop.eup %733 }
 0x214   : > { %v421_v26 = vsel %vm334_vm0, %v734_v25, 0.0  ;;  %v434_v27 = vpack.c.bf16 %v734_v25, %v734_v25  ;;  %v736_v29 = vpop.eup %735 }
 0x215   : > { %422 = vadd.xlane.f32.xlu1 %v421_v26  ;;  %v420_v31 = vmul.f32 %v736_v29, %v419_v30 }
 0x216   : > { %683 = vmatmul.mubr.msk.bf16.vlgmr.msra.gmra.mrb[0].mxu1 %vm334_vm0, %v434_v27 }
 0x226   : > { %430 = vperm.xlu1 %732, %v736_v29  }
 0x2a2   : > { %v423_v32 = vpop.xlane.xlu1 %422 }
 0x2a3   : > { %v424_v33 = vadd.f32 %v423_v32, %v420_v31 }
 0x2a5   : > { %426 = vst.msk [vmem:[#allocation3] sm:$0xff] %vm331_vm2, %v424_v33 }
 0x2a6   : > { %v431_v37 = vpop.permute.xlu1 %430 }
 0x2a7   : > { %v433_v38 = vmul.f32 %v431_v37, %v427_v36 }
 0x2ac   : > { %v489_v34 = vld [vmem:[#allocation3] sm:$0xff] }
 0x2ad   : > { %737 = vrcp.f32 %v489_v34 }
 0x2b7   : > { %v738_v35 = vpop.eup %737 }
 0x2b8   : > { %494 = vperm.xlu1 %732, %v738_v35  }
 0x2e9   : > { %v477_v39 = vpop.f32.mrb[0].mxu1 }
 0x2ea   : > { %v483_v40 = vadd.f32 %v477_v39, %v433_v38  ;;  %v684_v41 = vpop.f32.mrb[1].mxu1 }
 0x2eb   : > { %v480_v42 = vpop.f32.mrb[2].mxu1 }
 0x2ec   : > { %484 = vst.msk [vmem:[#allocation4] sm:$0xff] %vm334_vm0, %v483_v40  ;;  %v685_v43 = vpop.f32.mrb[3].mxu1 }
 0x2f3   : > { %v491_v44 = vld [vmem:[#allocation4] sm:$0xff] }
 0x337   : > { %v495_v45 = vpop.permute.xlu1 %494 }
 0x338   : > { %v497_v46 = vmul.f32 %v495_v45, %v491_v44 }
 0x33a   : > { %v498_v47 = vpack.c.bf16 %v497_v46, %v497_v46 }
 0x33c   : > { %500 = vst.msk [vmem:[%s324_s9] sm:$0xf] %vm499_vm5, %v498_v47 }
 0x33d PF: > { %s13_s16 = sadd.s32 1, %s777_s16   ;;  %s888_s12 = smov %s769_s14 }
 0x33e   : > { %p10_p7 = scmp.ge.s32.totalorder %s13_s16, 10   ;;  %s889_s13 = smov %s773_s15 }
 0x33f   : > { %s890_s14 = smov %s893_s17  ;;  %s891_s15 = smov %s897_s18 }
 0x340   :  { %12 = sbr.rel (!%p10_p7) target bundleno = 3 (0x3), region = 80 }

// kernel: gpt2_wrapper_forward.13
= control target key start
LH: loop header
LB: loop body
LE: loop exit
PB: predicated region body
PF: predicated region fallthrough
CT: control target
= control target key end

     0   :  { %v124_v0 = vmov 0.0   ;;  %vm125_vm0 = vmmov 0   ;;  %vm48_vm1 = vcmask 261120   ;;  %s178_s1 = inlined_call_operand.vmem [shape: bf16[32,32], index: 1, kind: input, shape index: {}]   ;;  %s179_s0 = inlined_call_operand.vmem [shape: bf16[16,32], index: 0, kind: input, shape index: {}]   ;;  %s180_s2 = inlined_call_operand.vmem [shape: f32[1,32], index: 2, kind: input, shape index: {}]   ;;  %s181_s3 = inlined_call_operand.vmem [shape: f32[16,32], index: 3, kind: input, shape index: {}]   ;;  %s182_s4 = inlined_call_operand.vmem [shape: f32[16,32], index: 4, kind: output, shape index: {}]  }
   0x1   :  { %111 = vmatprep.subr.bf16.mxu0 %v124_v0  ;;  %v121_v1 = vld [vmem:[%s178_s1] sm:$0xff]   ;;  %115 = vmatprep.mubr.msk.bf16.mxu0 %vm125_vm0, %v124_v0  ;;  %v122_v2 = vld [vmem:[%s178_s1 + $0x8] sm:$0xff]  }
   0x2   :  { %112 = vmatpush3.bf16.msra.mxu0 %v121_v1  ;;  %v123_v3 = vld [vmem:[%s179_s0] sm:$0xff]   ;;  %v94_v10 = vld [vmem:[%s181_s3 + $0x8] sm:$0xff] }
   0x3   :  { %113 = vmatprep.subr.bf16.mxu0 %v124_v0  ;;  %v103_v4 = vld [vmem:[%s180_s2] ss:$0 sm:$0xff] }
   0x4   :  { %v93_v6 = vld [vmem:[%s181_s3] sm:$0xff] }
   0x6   :  { %114 = vmatpush3.bf16.msra.mxu0 %v122_v2 }
   0x9   :  { %116 = vmatmul.mubr.msk.bf16.vlgmr.msra.gmra.mrb[0].mxu0 %vm48_vm1, %v123_v3 }
  0xdc   :  { %v86_v5 = vpop.f32.mrb[0].mxu0 }
  0xdd   :  { %v87_v7 = vadd.f32 %v103_v4, %v86_v5  ;;  %v117_v8 = vpop.f32.mrb[1].mxu0 }
  0xde   :  { %v89_v9 = vpop.f32.mrb[2].mxu0 }
  0xdf   :  { %v95_v11 = vadd.f32 %v93_v6, %v87_v7  ;;  %v90_v12 = vadd.f32 %v103_v4, %v89_v9  ;;  %v118_v13 = vpop.f32.mrb[3].mxu0 }
  0xe1   :  { %97 = vst.msk [vmem:[%s182_s4] sm:$0xff] %vm48_vm1, %v95_v11  ;;  %v96_v14 = vadd.f32 %v94_v10, %v90_v12 }
  0xe3   :  { %98 = vst.msk [vmem:[%s182_s4 + $0x8] sm:$0xff] %vm48_vm1, %v96_v14 }

// kernel: gpt2_wrapper_forward.14
= control target key start
LH: loop header
LB: loop body
LE: loop exit
PB: predicated region body
PF: predicated region fallthrough
CT: control target
= control target key end

     0   :  { %vm27_vm0 = vcmask 261120   ;;  %v217_v9 = vmov 0.0   ;;  %vm218_vm1 = vmmov 0   ;;  %s279_s0 = inlined_call_operand.vmem [shape: f32[16,32], index: 0, kind: input, shape index: {}]   ;;  %s280_s1 = inlined_call_operand.vmem [shape: bf16[32,128], index: 1, kind: input, shape index: {}]   ;;  %s281_s3 = inlined_call_operand.vmem [shape: f32[1,32], index: 3, kind: input, shape index: {}]   ;;  %s282_s4 = inlined_call_operand.vmem [shape: f32[1,32], index: 4, kind: input, shape index: {}]   ;;  %s283_s2 = inlined_call_operand.vmem [shape: f32[1,128], index: 2, kind: input, shape index: {}]   ;;  %s284_s5 = inlined_call_operand.vmem [shape: bf16[16,128], index: 5, kind: output, shape index: {}]  }
   0x1   :  { %v25_v0 = vld [vmem:[%s279_s0] sm:$0xff]  ;;  %v26_v1 = vld [vmem:[%s279_s0 + $0x8] sm:$0xff]  ;;  %197 = vmatprep.subr.bf16.mxu0 %v217_v9  ;;  %201 = vmatprep.mubr.msk.bf16.mxu0 %vm218_vm1, %v217_v9 }
   0x2   :  { %v28_v2 = vsel %vm27_vm0, %v25_v0, 0.0  ;;  %v34_v3 = vmul.f32 %v25_v0, %v25_v0  ;;  %v35_v4 = vmul.f32 %v26_v1, %v26_v1  ;;  %v31_v6 = vsel %vm27_vm0, %v26_v1, 0.0  ;;  %v207_v8 = vld [vmem:[%s280_s1] sm:$0xff]   ;;  %v208_v10 = vld [vmem:[%s280_s1 + $0x8] sm:$0xff]  }
   0x3   :  { %29 = vadd.xlane.f32.xlu0 %v28_v2  ;;  %198 = vmatpush3.bf16.msra.mxu0 %v207_v8  ;;  %v179_v28 = vld [vmem:[%s281_s3] ss:$0 sm:$0xff] }
   0x4   :  { %v36_v5 = vsel %vm27_vm0, %v34_v3, 0.0  ;;  %v39_v7 = vsel %vm27_vm0, %v35_v4, 0.0  ;;  %199 = vmatprep.subr.bf16.mxu0 %v217_v9  ;;  %v180_v33 = vld [vmem:[%s282_s4] ss:$0 sm:$0xff] }
   0x5   :  { %37 = vadd.xlane.f32.xlu1 %v36_v5  ;;  %v181_v39 = vld [vmem:[%s283_s2] ss:$0 sm:$0xff] }
   0x7   :  { %32 = vadd.xlane.f32.xlu0 %v31_v6  ;;  %200 = vmatpush3.bf16.msra.mxu0 %v208_v10 }
   0x9   :  { %40 = vadd.xlane.f32.xlu1 %v39_v7 }
  0x90   :  { %v30_v11 = vpop.xlane.xlu0 %29 }
  0x91   :  { %v42_v12 = vmul.f32 0.03125, %v30_v11 }
  0x92   :  { %v38_v13 = vpop.xlane.xlu1 %37 }
  0x93   :  { %v46_v14 = vmul.f32 %v42_v12, %v42_v12  ;;  %v44_v15 = vmul.f32 0.03125, %v38_v13  ;;  %v50_v25 = vsub.f32 %v25_v0, %v42_v12 }
  0x94   :  { %v33_v16 = vpop.xlane.xlu0 %32 }
  0x95   :  { %v48_v17 = vsub.f32 %v44_v15, %v46_v14  ;;  %v43_v18 = vmul.f32 0.03125, %v33_v16 }
  0x96   :  { %v41_v19 = vpop.xlane.xlu1 %40 }
  0x97   :  { %v52_v20 = vadd.f32 1e-05, %v48_v17  ;;  %v47_v21 = vmul.f32 %v43_v18, %v43_v18  ;;  %v45_v22 = vmul.f32 0.03125, %v41_v19  ;;  %v51_v29 = vsub.f32 %v26_v1, %v43_v18 }
  0x99   :  { %209 = vrsqrt.f32 %v52_v20  ;;  %v49_v23 = vsub.f32 %v45_v22, %v47_v21 }
  0x9b   :  { %v53_v24 = vadd.f32 1e-05, %v49_v23 }
  0x9d   :  { %211 = vrsqrt.f32 %v53_v24 }
  0xa3   :  { %v210_v26 = vpop.eup %209 }
  0xa4   :  { %v56_v27 = vmul.f32 %v210_v26, %v50_v25 }
  0xa6   :  { %v65_v31 = vmul.f32 %v179_v28, %v56_v27 }
  0xa7   :  { %v212_v30 = vpop.eup %211 }
  0xa8   :  { %v57_v32 = vmul.f32 %v212_v30, %v51_v29  ;;  %v74_v35 = vadd.f32 %v180_v33, %v65_v31 }
  0xaa   :  { %v66_v34 = vmul.f32 %v179_v28, %v57_v32 }
  0xac   :  { %v75_v36 = vadd.f32 %v180_v33, %v66_v34 }
  0xae   :  { %v76_v37 = vpack.c.bf16 %v75_v36, %v74_v35 }
  0xb0   :  { %77 = vst.msk [vmem:[#allocation2] sm:$0xff] %vm27_vm0, %v76_v37 }
  0xb7   :  { %v78_v38 = vld [vmem:[#allocation2] sm:$0xff] }
  0xb8   :  { %202 = vmatmul.mubr.msk.bf16.vlgmr.msra.gmra.mrb[0].mxu0 %vm27_vm0, %v78_v38 }
 0x18b   :  { %v140_v40 = vpop.f32.mrb[0].mxu0 }
 0x18c   :  { %v141_v41 = vadd.f32 %v181_v39, %v140_v40  ;;  %v203_v42 = vpop.f32.mrb[1].mxu0 }
 0x18d   :  { %v143_v43 = vpop.f32.mrb[2].mxu0 }
 0x18e   :  { %v149_v44 = vmul.f32 0.044715, %v141_v41  ;;  %v144_v45 = vadd.f32 %v181_v39, %v143_v43  ;;  %v204_v46 = vpop.f32.mrb[3].mxu0  ;;  %v147_v59 = vmul.f32 0.5, %v141_v41 }
 0x190   :  { %v151_v47 = vmul.f32 %v149_v44, %v141_v41  ;;  %v150_v48 = vmul.f32 0.044715, %v144_v45  ;;  %v148_v60 = vmul.f32 0.5, %v144_v45 }
 0x192   :  { %v153_v49 = vmul.f32 %v151_v47, %v141_v41  ;;  %v152_v50 = vmul.f32 %v150_v48, %v144_v45 }
 0x194   :  { %v155_v51 = vadd.f32 %v153_v49, %v141_v41  ;;  %v154_v52 = vmul.f32 %v152_v50, %v144_v45 }
 0x196   :  { %v157_v53 = vmul.f32 0.7978846, %v155_v51  ;;  %v156_v54 = vadd.f32 %v154_v52, %v144_v45 }
 0x198   :  { %213 = vtanh.f32 %v157_v53  ;;  %v158_v55 = vmul.f32 0.7978846, %v156_v54 }
 0x19a   :  { %215 = vtanh.f32 %v158_v55 }
 0x1a2   :  { %v214_v56 = vpop.eup %213 }
 0x1a3   :  { %v161_v57 = vadd.f32 1.0, %v214_v56 }
 0x1a4   :  { %v216_v58 = vpop.eup %215 }
 0x1a5   :  { %v162_v61 = vadd.f32 1.0, %v216_v58  ;;  %v163_v62 = vmul.f32 %v161_v57, %v147_v59 }
 0x1a7   :  { %v164_v63 = vmul.f32 %v162_v61, %v148_v60 }
 0x1a9   :  { %v192_v0 = vpack.c.bf16 %v164_v63, %v163_v62 }
 0x1ab   :  { %193 = vst [vmem:[%s284_s5] sm:$0xff] %v192_v0  }

// kernel: gpt2_wrapper_forward.15
= control target key start
LH: loop header
LB: loop body
LE: loop exit
PB: predicated region body
PF: predicated region fallthrough
CT: control target
= control target key end

     0   :  { %v199_v0 = vmov 0.0   ;;  %vm200_vm0 = vmmov 0   ;;  %vm142_vm1 = vcmask 261120   ;;  %s268_s1 = inlined_call_operand.vmem [shape: bf16[128,32], index: 1, kind: input, shape index: {}]   ;;  %s269_s0 = inlined_call_operand.vmem [shape: bf16[16,128], index: 0, kind: input, shape index: {}]   ;;  %s270_s2 = inlined_call_operand.vmem [shape: f32[1,32], index: 2, kind: input, shape index: {}]   ;;  %s271_s3 = inlined_call_operand.vmem [shape: f32[16,32], index: 3, kind: input, shape index: {}]   ;;  %s272_s4 = inlined_call_operand.vmem [shape: f32[16,32], index: 4, kind: output, shape index: {}]  }
   0x1   :  { %168 = vmatprep.subr.bf16.mxu0 %v199_v0  ;;  %v190_v1 = vld [vmem:[%s268_s1] sm:$0xff]   ;;  %184 = vmatprep.mubr.msk.bf16.mxu0 %vm200_vm0, %v199_v0  ;;  %v191_v2 = vld [vmem:[%s268_s1 + $0x8] sm:$0xff]   ;;  %v192_v3 = vld [vmem:[%s268_s1 + $0x10] sm:$0xff]  }
   0x2   :  { %169 = vmatpush3.bf16.msra.mxu0 %v190_v1  ;;  %v193_v4 = vld [vmem:[%s268_s1 + $0x18] sm:$0xff]   ;;  %v194_v5 = vld [vmem:[%s268_s1 + $0x20] sm:$0xff]   ;;  %v195_v6 = vld [vmem:[%s268_s1 + $0x28] sm:$0xff]  }
   0x3   :  { %170 = vmatprep.subr.bf16.mxu0 %v199_v0  ;;  %v196_v7 = vld [vmem:[%s268_s1 + $0x30] sm:$0xff]   ;;  %v197_v8 = vld [vmem:[%s268_s1 + $0x38] sm:$0xff]   ;;  %v198_v9 = vld [vmem:[%s269_s0] sm:$0xff]  }
   0x4   :  { %v149_v10 = vld [vmem:[%s270_s2] ss:$0 sm:$0xff]  ;;  %v139_v16 = vld [vmem:[%s271_s3 + $0x8] sm:$0xff] }
   0x5   :  { %v138_v12 = vld [vmem:[%s271_s3] sm:$0xff] }
   0x6   :  { %171 = vmatpush3.bf16.msra.mxu0 %v191_v2 }
   0x7   :  { %172 = vmatprep.subr.bf16.mxu0 %v199_v0 }
   0xa   :  { %173 = vmatpush3.bf16.msra.mxu0 %v192_v3 }
   0xb   :  { %174 = vmatprep.subr.bf16.mxu0 %v199_v0 }
   0xe   :  { %175 = vmatpush3.bf16.msra.mxu0 %v193_v4 }
   0xf   :  { %176 = vmatprep.subr.bf16.mxu0 %v199_v0 }
  0x12   :  { %177 = vmatpush3.bf16.msra.mxu0 %v194_v5 }
  0x13   :  { %178 = vmatprep.subr.bf16.mxu0 %v199_v0 }
  0x16   :  { %179 = vmatpush3.bf16.msra.mxu0 %v195_v6 }
  0x17   :  { %180 = vmatprep.subr.bf16.mxu0 %v199_v0 }
  0x1a   :  { %181 = vmatpush3.bf16.msra.mxu0 %v196_v7 }
  0x1b   :  { %182 = vmatprep.subr.bf16.mxu0 %v199_v0 }
  0x1e   :  { %183 = vmatpush3.bf16.msra.mxu0 %v197_v8 }
  0x21   :  { %185 = vmatmul.mubr.bf16.vlgmr.msra.gmra.mrb[0].mxu0 %v198_v9 }
  0xf4   :  { %v131_v11 = vpop.f32.mrb[0].mxu0 }
  0xf5   :  { %v132_v13 = vadd.f32 %v149_v10, %v131_v11  ;;  %v186_v14 = vpop.f32.mrb[1].mxu0 }
  0xf6   :  { %v134_v15 = vpop.f32.mrb[2].mxu0 }
  0xf7   :  { %v140_v17 = vadd.f32 %v138_v12, %v132_v13  ;;  %v135_v18 = vadd.f32 %v149_v10, %v134_v15  ;;  %v187_v19 = vpop.f32.mrb[3].mxu0 }
  0xf9   :  { %143 = vst.msk [vmem:[%s272_s4] sm:$0xff] %vm142_vm1, %v140_v17  ;;  %v141_v20 = vadd.f32 %v139_v16, %v135_v18 }
  0xfb   :  { %144 = vst.msk [vmem:[%s272_s4 + $0x8] sm:$0xff] %vm142_vm1, %v141_v20 }

// kernel: gpt2_wrapper_forward.21
= control target key start
LH: loop header
LB: loop body
LE: loop exit
PB: predicated region body
PF: predicated region fallthrough
CT: control target
= control target key end

     0   :  { %vm30_vm0 = vcmask 261120   ;;  %v330_v9 = vmov 0.0   ;;  %vm331_vm1 = vmmov 0   ;;  %vm81_vm2 = vcmask 7168   ;;  %s441_s0 = inlined_call_operand.vmem [shape: f32[16,32], index: 0, kind: input, shape index: {}]   ;;  %s442_s3 = inlined_call_operand.vmem [shape: bf16[64,32], index: 3, kind: input, shape index: {}]   ;;  %s443_s1 = inlined_call_operand.vmem [shape: f32[1,32], index: 1, kind: input, shape index: {}]   ;;  %s444_s2 = inlined_call_operand.vmem [shape: f32[1,32], index: 2, kind: input, shape index: {}]   ;;  %s445_s4 = inlined_call_operand.vmem [shape: s32[16,1], index: 4, kind: input, shape index: {}]   ;;  %s446_s5 = inlined_call_operand.vmem [shape: f32[16,1], index: 5, kind: input, shape index: {}]   ;;  %s447_s6 = inlined_call_operand.vmem [shape: f32[16,1], index: 6, kind: output, shape index: {}]  }
   0x1   :  { %v28_v0 = vld [vmem:[%s441_s0] sm:$0xff]  ;;  %v29_v1 = vld [vmem:[%s441_s0 + $0x8] sm:$0xff]  ;;  %292 = vmatprep.subr.bf16.mxu0 %v330_v9  ;;  %v312_v13 = vld [vmem:[%s442_s3 + $0x10] sm:$0xff]   ;;  %300 = vmatprep.mubr.msk.bf16.mxu0 %vm331_vm1, %v330_v9  ;;  %v332_v45 = vmov -inf   ;;  %84 = vst.msk [vmem:[#allocation4] sm:$0xff] %vm81_vm2, %v330_v9  ;;  %vm181_vm3 = vcmask 523264  }
   0x2   :  { %v31_v2 = vsel %vm30_vm0, %v28_v0, 0.0  ;;  %v37_v3 = vmul.f32 %v28_v0, %v28_v0  ;;  %v38_v4 = vmul.f32 %v29_v1, %v29_v1  ;;  %v34_v6 = vsel %vm30_vm0, %v29_v1, 0.0  ;;  %v310_v8 = vld [vmem:[%s442_s3] sm:$0xff]   ;;  %v311_v11 = vld [vmem:[%s442_s3 + $0x8] sm:$0xff]   ;;  %v313_v15 = vld [vmem:[%s442_s3 + $0x18] sm:$0xff]   ;;  %82 = vst.msk [vmem:[#allocation3] sm:$0xff] %vm81_vm2, %v332_v45 }
   0x3   :  { %32 = vadd.xlane.f32.xlu0 %v31_v2  ;;  %v122_v10 = vsel %vm30_vm0, %v310_v8, 0  ;;  %v125_v12 = vsel %vm30_vm0, %v311_v11, 0  ;;  %v128_v14 = vsel %vm30_vm0, %v312_v13, 0  ;;  %v131_v16 = vsel %vm30_vm0, %v313_v15, 0  ;;  %v280_v34 = vld [vmem:[%s443_s1] ss:$0 sm:$0xff] }
   0x4   :  { %v39_v5 = vsel %vm30_vm0, %v37_v3, 0.0  ;;  %v42_v7 = vsel %vm30_vm0, %v38_v4, 0.0  ;;  %293 = vmatpush3.bf16.xpose.msra.mxu0 %v122_v10  ;;  %v281_v39 = vld [vmem:[%s444_s2] ss:$0 sm:$0xff]  ;;  %83 = vst.msk [vmem:[#allocation3 + $0x8] sm:$0xff] %vm81_vm2, %v332_v45  ;;  %85 = vst.msk [vmem:[#allocation4 + $0x8] sm:$0xff] %vm81_vm2, %v330_v9 }
   0x5   :  { %40 = vadd.xlane.f32.xlu1 %v39_v5  ;;  %294 = vmatprep.subr.bf16.mxu0 %v330_v9  ;;  %86 = vst.msk [vmem:[#allocation5] sm:$0xff] %vm81_vm2, %v330_v9  ;;  %87 = vst.msk [vmem:[#allocation5 + $0x8] sm:$0xff] %vm81_vm2, %v330_v9  ;;  %v333_v52 = vmov 0   ;;  %v229_v61 = vld [vmem:[%s445_s4] sm:$0xff]  ;;  %v230_v62 = vld [vmem:[%s445_s4 + $0x8] sm:$0xff]  ;;  %v174_v5 = vlaneseq }
   0x6   :  { %308 = vset.pattern.permute.xlu0 %v333_v52  ;;  %309 = vset.pattern.permute.xlu1 %v333_v52 }
   0x7   :  { %35 = vadd.xlane.f32.xlu0 %v34_v6 }
   0x9   :  { %43 = vadd.xlane.f32.xlu1 %v42_v7  ;;  %v179_v53 = vld [vmem:[#allocation3] sm:$0xff]  ;;  %v175_v7 = vand.u32 127, %v174_v5 }
   0xb   :  { %v180_v55 = vld [vmem:[#allocation3 + $0x8] sm:$0xff] }
   0xc   :  { %295 = vmatpush3.bf16.xpose.msra.mxu0 %v125_v12 }
   0xd   :  { %296 = vmatprep.subr.bf16.mxu0 %v330_v9 }
  0x14   :  { %297 = vmatpush3.bf16.xpose.msra.mxu0 %v128_v14 }
  0x15   :  { %298 = vmatprep.subr.bf16.mxu0 %v330_v9 }
  0x1c   :  { %299 = vmatpush3.bf16.xpose.msra.mxu0 %v131_v16 }
  0x90   :  { %v33_v17 = vpop.xlane.xlu0 %32 }
  0x91   :  { %v45_v18 = vmul.f32 0.03125, %v33_v17 }
  0x92   :  { %v41_v19 = vpop.xlane.xlu1 %40 }
  0x93   :  { %v49_v20 = vmul.f32 %v45_v18, %v45_v18  ;;  %v47_v21 = vmul.f32 0.03125, %v41_v19  ;;  %v53_v31 = vsub.f32 %v28_v0, %v45_v18 }
  0x94   :  { %v36_v22 = vpop.xlane.xlu0 %35 }
  0x95   :  { %v51_v23 = vsub.f32 %v47_v21, %v49_v20  ;;  %v46_v24 = vmul.f32 0.03125, %v36_v22  ;;  %v190_v20 = vld [vmem:[#allocation4] sm:$0xff]  ;;  %v191_v22 = vld [vmem:[#allocation4 + $0x8] sm:$0xff] }
  0x96   :  { %v44_v25 = vpop.xlane.xlu1 %43 }
  0x97   :  { %v55_v26 = vadd.f32 1e-05, %v51_v23  ;;  %v50_v27 = vmul.f32 %v46_v24, %v46_v24  ;;  %v48_v28 = vmul.f32 0.03125, %v44_v25  ;;  %v54_v35 = vsub.f32 %v29_v1, %v46_v24 }
  0x99   :  { %314 = vrsqrt.f32 %v55_v26  ;;  %v52_v29 = vsub.f32 %v48_v28, %v50_v27  ;;  %v239_v28 = vld [vmem:[#allocation5] sm:$0xff] }
  0x9b   :  { %v56_v30 = vadd.f32 1e-05, %v52_v29 }
  0x9d   :  { %316 = vrsqrt.f32 %v56_v30 }
  0xa3   :  { %v315_v32 = vpop.eup %314 }
  0xa4   :  { %v59_v33 = vmul.f32 %v315_v32, %v53_v31  ;;  %v240_v32 = vld [vmem:[#allocation5 + $0x8] sm:$0xff] }
  0xa6   :  { %v68_v37 = vmul.f32 %v280_v34, %v59_v33 }
  0xa7   :  { %v317_v36 = vpop.eup %316 }
  0xa8   :  { %v60_v38 = vmul.f32 %v317_v36, %v54_v35  ;;  %v77_v41 = vadd.f32 %v281_v39, %v68_v37 }
  0xaa   :  { %v69_v40 = vmul.f32 %v280_v34, %v60_v38 }
  0xac   :  { %v78_v42 = vadd.f32 %v281_v39, %v69_v40 }
  0xae   :  { %v79_v43 = vpack.c.bf16 %v78_v42, %v77_v41 }
  0xb0   :  { %80 = vst.msk [vmem:[#allocation2] sm:$0xff] %vm30_vm0, %v79_v43 }
  0xb7   :  { %v88_v44 = vld [vmem:[#allocation2] sm:$0xff] }
  0xb8   :  { %301 = vmatmul.mubr.msk.bf16.vlgmr.msra.gmra.mrb[0].mxu0 %vm30_vm0, %v88_v44  ;;  %v270_v44 = vld [vmem:[%s446_s5] sm:$0xff] }
 0x18b   :  { %v167_v46 = vpop.f32.mrb[0].mxu0 }
 0x18c   :  { %v302_v47 = vpop.f32.mrb[1].mxu0  ;;  %v182_v48 = vsel %vm181_vm3, %v167_v46, -inf }
 0x18d   :  { %183 = vmax.xlane.f32.xlu0 %v182_v48  ;;  %v170_v49 = vpop.f32.mrb[2].mxu0  ;;  %v271_v48 = vld [vmem:[%s446_s5 + $0x8] sm:$0xff] }
 0x18e   :  { %v303_v50 = vpop.f32.mrb[3].mxu0  ;;  %v185_v51 = vsel %vm181_vm3, %v170_v49, -inf }
 0x18f   :  { %186 = vmax.xlane.f32.xlu1 %v185_v51 }
 0x21a   :  { %v184_v54 = vpop.xlane.xlu0 %183 }
 0x21b   :  { %v188_v56 = vmax.f32 %v179_v53, %v184_v54 }
 0x21c   :  { %v187_v57 = vpop.xlane.xlu1 %186 }
 0x21d   :  { %v192_v58 = vsub.f32 %v179_v53, %v188_v56  ;;  %227 = vst.msk [vmem:[#allocation3] sm:$0xff] %vm81_vm2, %v188_v56  ;;  %v189_v59 = vmax.f32 %v180_v55, %v187_v57  ;;  %202 = vperm.xlu0 %308, %v188_v56  }
 0x21f   :  { %v193_v60 = vsub.f32 %v180_v55, %v189_v59  ;;  %228 = vst.msk [vmem:[#allocation3 + $0x8] sm:$0xff] %vm81_vm2, %v189_v59  ;;  %207 = vperm.xlu1 %309, %v189_v59   ;;  %v194_v17 = vmul.f32 1.442695, %v192_v58 }
 0x221   :  { %v196_v18 = vmul.f32 1.442695, %v193_v60 }
 0x223   :  { %232 = vperm.xlu1 %309, %v229_v61  }
 0x224   :  { %v256_v40 = vld [vmem:[#allocation3] sm:$0xff] }
 0x226   :  { %v257_v43 = vld [vmem:[#allocation3 + $0x8] sm:$0xff] }
 0x227   :  { %235 = vperm.xlu1 %309, %v230_v62  }
 0x29c   :  { %v203_v63 = vpop.permute.xlu0 %202 }
 0x29d   :  { %v210_v0 = vsub.f32 %v167_v46, %v203_v63 }
 0x29e   :  { %v208_v1 = vpop.permute.xlu1 %207 }
 0x29f   :  { %v212_v2 = vmul.f32 1.442695, %v210_v0  ;;  %v211_v3 = vsub.f32 %v170_v49, %v208_v1 }
 0x2a1   :  { %318 = vpow2.f32 %v212_v2  ;;  %v214_v4 = vmul.f32 1.442695, %v211_v3 }
 0x2a2   :  { %v233_v6 = vpop.permute.xlu1 %232 }
 0x2a3   :  { %320 = vpow2.f32 %v214_v4  ;;  %vm237_vm4 = vcmp.eq.s32.totalorder %v175_v7, %v233_v6 }
 0x2a4   :  { %v241_v12 = vsel %vm237_vm4, %v167_v46, 0.0  ;;  %322 = vpow2.f32 %v194_v17 }
 0x2a5   :  { %v243_v14 = vsel %vm181_vm3, %v241_v12, 0.0  ;;  %324 = vpow2.f32 %v196_v18 }
 0x2a6   :  { %v236_v9 = vpop.permute.xlu1 %235 }
 0x2a7   :  { %vm238_vm5 = vcmp.eq.s32.totalorder %v175_v7, %v236_v9 }
 0x2a8   :  { %v242_v15 = vsel %vm238_vm5, %v170_v49, 0.0 }
 0x2a9   :  { %v246_v16 = vsel %vm181_vm3, %v242_v15, 0.0 }
 0x2ab   :  { %v319_v8 = vpop.eup %318 }
 0x2ac   :  { %v216_v10 = vsel %vm181_vm3, %v319_v8, 0.0 }
 0x2ad   :  { %v321_v11 = vpop.eup %320  ;;  %217 = vadd.xlane.f32.xlu1 %v216_v10 }
 0x2ae   :  { %v219_v13 = vsel %vm181_vm3, %v321_v11, 0.0  ;;  %v323_v19 = vpop.eup %322 }
 0x2af   :  { %220 = vadd.xlane.f32.xlu0 %v219_v13  ;;  %v325_v21 = vpop.eup %324  ;;  %v198_v23 = vmul.f32 %v323_v19, %v190_v20 }
 0x2b0   :  { %v199_v26 = vmul.f32 %v325_v21, %v191_v22 }
 0x2b1   :  { %244 = vadd.xlane.f32.xlu1 %v243_v14 }
 0x2b5   :  { %247 = vadd.xlane.f32.xlu1 %v246_v16 }
 0x33a   :  { %v218_v24 = vpop.xlane.xlu1 %217 }
 0x33b   :  { %v222_v25 = vadd.f32 %v218_v24, %v198_v23 }
 0x33c   :  { %v221_v27 = vpop.xlane.xlu0 %220 }
 0x33d   :  { %225 = vst.msk [vmem:[#allocation4] sm:$0xff] %vm81_vm2, %v222_v25  ;;  %v223_v29 = vadd.f32 %v221_v27, %v199_v26 }
 0x33e   :  { %v245_v30 = vpop.xlane.xlu1 %244 }
 0x33f   :  { %226 = vst.msk [vmem:[#allocation4 + $0x8] sm:$0xff] %vm81_vm2, %v223_v29  ;;  %v249_v31 = vadd.f32 %v245_v30, %v239_v28 }
 0x341   :  { %251 = vst.msk [vmem:[#allocation5] sm:$0xff] %vm81_vm2, %v249_v31 }
 0x342   :  { %v248_v33 = vpop.xlane.xlu1 %247 }
 0x343   :  { %v250_v34 = vadd.f32 %v248_v33, %v240_v32 }
 0x344   :  { %v258_v35 = vld [vmem:[#allocation4] sm:$0xff] }
 0x345   :  { %326 = vlog2.f32 %v258_v35  ;;  %252 = vst.msk [vmem:[#allocation5 + $0x8] sm:$0xff] %vm81_vm2, %v250_v34 }
 0x346   :  { %v259_v36 = vld [vmem:[#allocation4 + $0x8] sm:$0xff] }
 0x347   :  { %328 = vlog2.f32 %v259_v36 }
 0x348   :  { %v266_v45 = vld [vmem:[#allocation5] sm:$0xff] }
 0x34c   :  { %v267_v49 = vld [vmem:[#allocation5 + $0x8] sm:$0xff] }
 0x34f   :  { %v327_v37 = vpop.eup %326 }
 0x350   :  { %v261_v38 = vmul.f32 0.6931472, %v327_v37 }
 0x351   :  { %v329_v39 = vpop.eup %328 }
 0x352   :  { %v264_v41 = vadd.f32 %v261_v38, %v256_v40  ;;  %v263_v42 = vmul.f32 0.6931472, %v329_v39 }
 0x354   :  { %v268_v46 = vsub.f32 %v264_v41, %v266_v45  ;;  %v265_v47 = vadd.f32 %v263_v42, %v257_v43 }
 0x356   :  { %v272_v50 = vmul.f32 %v270_v44, %v268_v46  ;;  %v269_v51 = vsub.f32 %v265_v47, %v267_v49 }
 0x358   :  { %274 = vst.msk [vmem:[%s447_s6] sm:$0xff] %vm81_vm2, %v272_v50  ;;  %v273_v52 = vmul.f32 %v271_v48, %v269_v51 }
 0x35a   :  { %275 = vst.msk [vmem:[%s447_s6 + $0x8] sm:$0xff] %vm81_vm2, %v273_v52 }

</bundles_post_ra>
